<compile_context>
chip_gen: v5e
topology: v5e:2x2
jax: 0.10.0
libtpu: 0.0.40
codegen_flags: <defaults>
</compile_context>

<pallas_src>
import functools

import jax
import jax.numpy as jnp
from jax.experimental import pallas as pl
from jax.experimental.pallas import tpu as pltpu


NOUT = 128  # lane-dense padded output width; real logits live in columns 0..1

# Keep the resident table well under v7x's 64 MiB physical VMEM (32 MiB scoped
# default), leaving headroom for the double-buffered length/weight/output blocks.
_MAX_RESIDENT_TABLE_BYTES = 24 * 1024 * 1024


def _make_bow_kernel(seq_len: int):
    """Build the kernel for a fixed (static) sequence length."""

    def bow_kernel(ids_ref, emb_ref, len_ref, w_ref, b_ref, out_ref):
        """One grid step processes TB batch rows.

        ids_ref : (Bp*L,)   int32  SMEM (scalar prefetch)  flattened token ids
        emb_ref : (V, E)    f32    VMEM (resident: constant index_map)
        len_ref : (TB, 1)   f32    VMEM  non-pad lengths for this tile
        w_ref   : (E, 128)  f32    VMEM  linear weight.T, lane-padded
        b_ref   : (1, 128)  f32    VMEM  bias, lane-padded
        out_ref : (TB, 128) f32    VMEM  padded logits (cols 0..1 valid)
        """
        TB = out_ref.shape[0]
        E = emb_ref.shape[1]
        L = seq_len
        off = pl.program_id(0) * (TB * L)   # first flattened id of this tile

        # Sum of embeddings over the sequence, gathered from the resident table.
        # L and TB are small and static -> fully unrolled; each position gathers
        # TB rows with dynamic-slice loads and adds one (TB, E) slab to acc.
        # TODO(synk): for large L / batch_tile switch the outer position loop to
        # lax.fori_loop(..., unroll=True) to bound code size.
        acc = jnp.zeros((TB, E), jnp.float32)
        for l in range(L):
            rows = [
                emb_ref[pl.ds(ids_ref[off + tb * L + l], 1), :]   # (1, E)
                for tb in range(TB)
            ]
            acc = acc + jnp.concatenate(rows, axis=0)             # (TB, E)

        # Divide by the true (non-padding) sentence length (PyTorch: out /= length).
        # One exact f32 divide per row, then a broadcast multiply.
        inv = 1.0 / len_ref[...]                                  # (TB, 1)
        bag = acc * inv                                           # (TB, E)

        # Final linear, lane-padded to NOUT so the store is an unmasked vst.
        out_ref[...] = (
            jnp.dot(bag, w_ref[...], preferred_element_type=jnp.float32)
            + b_ref[...]
        )

    return bow_kernel


def bag_of_words(data, length, emb, weight, bias, *, batch_tile=8):
    """Forward pass of BagOfWords.

    data:   (B, L) int token ids (0 = padding)
    length: (B,)   non-padding lengths
    emb:    (V, E) embedding table (nn.Embedding, padding_idx=0 -> row 0 zero)
    weight: (2, E) torch-style nn.Linear weight
    bias:   (2,)
    returns (B, 2) float32 logits
    """
    B, L = data.shape
    V, E = emb.shape
    assert batch_tile % 8 == 0, "batch_tile must be a multiple of 8 (sublane tiling)"

    table_bytes = V * E * 4
    # TODO(synk): for vocabularies whose table exceeds the VMEM budget, fall back
    # to an HBM manual-DMA gather path (deep prefetch ring) instead of asserting.
    assert table_bytes <= _MAX_RESIDENT_TABLE_BYTES, (
        "embedding table too large for the VMEM-resident gather path")

    # Pad the batch so every output block is (8, 128)-aligned.
    Bp = ((B + batch_tile - 1) // batch_tile) * batch_tile

    # Flattened 1D token ids for SMEM scalar prefetch (row b occupies [b*L, (b+1)*L)).
    ids_flat = (
        jnp.zeros((Bp * L,), jnp.int32)
        .at[: B * L]
        .set(data.astype(jnp.int32).reshape(B * L))
    )
    # Padding rows get length 1 (they are sliced off; avoids 1/0 on dead rows).
    len_p = jnp.ones((Bp, 1), jnp.float32).at[:B, 0].set(length.astype(jnp.float32))

    # Fold the (2, E) linear into a lane-dense (E, 128) projection (cols >= 2 zero).
    w_pad = jnp.zeros((E, NOUT), jnp.float32).at[:, :2].set(
        weight.astype(jnp.float32).T)
    b_pad = jnp.zeros((1, NOUT), jnp.float32).at[0, :2].set(bias.astype(jnp.float32))

    grid = (Bp // batch_tile,)
    kernel = _make_bow_kernel(L)

    out_padded = pl.pallas_call(
        kernel,
        out_shape=jax.ShapeDtypeStruct((Bp, NOUT), jnp.float32),
        grid_spec=pltpu.PrefetchScalarGridSpec(
            num_scalar_prefetch=1,                                     # ids -> SMEM
            grid=grid,
            in_specs=[
                # Constant index_map => table loaded once, resident across steps.
                pl.BlockSpec((V, E), lambda i, ids: (0, 0)),           # embedding
                pl.BlockSpec((batch_tile, 1), lambda i, ids: (i, 0)),  # lengths
                pl.BlockSpec((E, NOUT), lambda i, ids: (0, 0)),        # padded weight
                pl.BlockSpec((1, NOUT), lambda i, ids: (0, 0)),        # padded bias
            ],
            out_specs=pl.BlockSpec((batch_tile, NOUT), lambda i, ids: (i, 0)),
            scratch_shapes=[],
        ),
        compiler_params=pltpu.CompilerParams(
            dimension_semantics=("parallel",),   # batch tiles shard across TCs (v7x)
            vmem_limit_bytes=64 << 20,           # table + blocks, with headroom
        ),
        cost_estimate=pl.CostEstimate(
            flops=2 * Bp * E * NOUT + Bp * L * E,
            transcendentals=0,
            bytes_accessed=(V * E * 4            # resident table, loaded once
                            + Bp * L * 4         # token ids
                            + Bp * 4             # lengths
                            + E * NOUT * 4 + NOUT * 4
                            + Bp * NOUT * 4),    # padded output
        ),
    )(ids_flat, emb.astype(jnp.float32), len_p, w_pad, b_pad)

    return out_padded[:B, :2]


if __name__ == "__main__":
    # Small, deterministic setup consistent with the module's forward().
    B, L, V, E = 16, 8, 512, 32

    key = jax.random.PRNGKey(0)
    k_emb, k_w, k_b, k_data, k_len = jax.random.split(key, 5)

    # nn.Embedding(vocab_size, emb_dim, padding_idx=0): row 0 is zero.
    emb = jax.random.normal(k_emb, (V, E), dtype=jnp.float32)
    emb = emb.at[0].set(0.0)

    # nn.Linear(emb_dim, 2): weight (2, E), bias (2,)
    weight = jax.random.normal(k_w, (2, E), dtype=jnp.float32) * 0.1
    bias = jax.random.normal(k_b, (2,), dtype=jnp.float32) * 0.1

    # Token ids, with trailing padding (id 0) per the given lengths.
    lengths = jax.random.randint(k_len, (B,), minval=3, maxval=L + 1)
    data = jax.random.randint(k_data, (B, L), minval=1, maxval=V)
    pos = jnp.arange(L)[None, :]
    data = jnp.where(pos < lengths[:, None], data, 0).astype(jnp.int32)

    out = bag_of_words(data, lengths, emb, weight, bias)
    out = jax.block_until_ready(out)

    # Pure-JAX reference of the PyTorch semantics.
    ref = emb[data].sum(axis=1) / lengths[:, None].astype(jnp.float32)
    ref = ref @ weight.T + bias

    assert out.shape == (B, 2)
    assert jnp.allclose(out, ref, atol=1e-4, rtol=1e-4), "mismatch vs reference"
    print("KERNEL_OK")
</pallas_src>

<mosaic_0001>
module attributes {stable_mosaic.version = 11 : i64} {
  func.func @bow_kernel(%arg0: i32, %arg1: memref<128xi32, #tpu.memory_space<smem>>, %arg2: memref<512x32xf32, #tpu.memory_space<vmem>>, %arg3: memref<8x1xf32, #tpu.memory_space<vmem>>, %arg4: memref<32x128xf32, #tpu.memory_space<vmem>>, %arg5: memref<1x128xf32, #tpu.memory_space<vmem>>, %arg6: memref<8x128xf32, #tpu.memory_space<vmem>>) attributes {dimension_semantics = [#tpu.dimension_semantics<parallel>], iteration_bounds = array<i64: 2>, scalar_prefetch = 1 : i64, scratch_operands = 0 : i64, tpu.core_type = #tpu.core_type<tc>, window_params = [{pipeline_mode = #tpu.pipeline_mode<synchronous>, transform_indices = @transform_0, window_bounds = array<i64: 512, 32>}, {transform_indices = @transform_1, window_bounds = array<i64: 8, 1>}, {pipeline_mode = #tpu.pipeline_mode<synchronous>, transform_indices = @transform_2, window_bounds = array<i64: 32, 128>}, {pipeline_mode = #tpu.pipeline_mode<synchronous>, transform_indices = @transform_3, window_bounds = array<i64: 1, 128>}, {transform_indices = @transform_4, window_bounds = array<i64: 8, 128>}]} {
    %c64_i32 = arith.constant 64 : i32
    %0 = arith.muli %arg0, %c64_i32 : i32
    %cst = arith.constant 0.000000e+00 : f32
    %1 = vector.broadcast %cst : f32 to vector<8x32xf32>
    %c0_i32 = arith.constant 0 : i32
    %2 = arith.addi %0, %c0_i32 : i32
    %c0_i32_0 = arith.constant 0 : i32
    %3 = arith.addi %2, %c0_i32_0 : i32
    %4 = arith.index_cast %3 : i32 to index
    %5 = memref.load %arg1[%4] : memref<128xi32, #tpu.memory_space<smem>>
    %6 = arith.index_cast %5 : i32 to index
    %c0 = arith.constant 0 : index
    %7 = vector.load %arg2[%6, %c0] : memref<512x32xf32, #tpu.memory_space<vmem>>, vector<1x32xf32>
    %c8_i32 = arith.constant 8 : i32
    %8 = arith.addi %0, %c8_i32 : i32
    %c0_i32_1 = arith.constant 0 : i32
    %9 = arith.addi %8, %c0_i32_1 : i32
    %10 = arith.index_cast %9 : i32 to index
    %11 = memref.load %arg1[%10] : memref<128xi32, #tpu.memory_space<smem>>
    %12 = arith.index_cast %11 : i32 to index
    %c0_2 = arith.constant 0 : index
    %13 = vector.load %arg2[%12, %c0_2] : memref<512x32xf32, #tpu.memory_space<vmem>>, vector<1x32xf32>
    %c16_i32 = arith.constant 16 : i32
    %14 = arith.addi %0, %c16_i32 : i32
    %c0_i32_3 = arith.constant 0 : i32
    %15 = arith.addi %14, %c0_i32_3 : i32
    %16 = arith.index_cast %15 : i32 to index
    %17 = memref.load %arg1[%16] : memref<128xi32, #tpu.memory_space<smem>>
    %18 = arith.index_cast %17 : i32 to index
    %c0_4 = arith.constant 0 : index
    %19 = vector.load %arg2[%18, %c0_4] : memref<512x32xf32, #tpu.memory_space<vmem>>, vector<1x32xf32>
    %c24_i32 = arith.constant 24 : i32
    %20 = arith.addi %0, %c24_i32 : i32
    %c0_i32_5 = arith.constant 0 : i32
    %21 = arith.addi %20, %c0_i32_5 : i32
    %22 = arith.index_cast %21 : i32 to index
    %23 = memref.load %arg1[%22] : memref<128xi32, #tpu.memory_space<smem>>
    %24 = arith.index_cast %23 : i32 to index
    %c0_6 = arith.constant 0 : index
    %25 = vector.load %arg2[%24, %c0_6] : memref<512x32xf32, #tpu.memory_space<vmem>>, vector<1x32xf32>
    %c32_i32 = arith.constant 32 : i32
    %26 = arith.addi %0, %c32_i32 : i32
    %c0_i32_7 = arith.constant 0 : i32
    %27 = arith.addi %26, %c0_i32_7 : i32
    %28 = arith.index_cast %27 : i32 to index
    %29 = memref.load %arg1[%28] : memref<128xi32, #tpu.memory_space<smem>>
    %30 = arith.index_cast %29 : i32 to index
    %c0_8 = arith.constant 0 : index
    %31 = vector.load %arg2[%30, %c0_8] : memref<512x32xf32, #tpu.memory_space<vmem>>, vector<1x32xf32>
    %c40_i32 = arith.constant 40 : i32
    %32 = arith.addi %0, %c40_i32 : i32
    %c0_i32_9 = arith.constant 0 : i32
    %33 = arith.addi %32, %c0_i32_9 : i32
    %34 = arith.index_cast %33 : i32 to index
    %35 = memref.load %arg1[%34] : memref<128xi32, #tpu.memory_space<smem>>
    %36 = arith.index_cast %35 : i32 to index
    %c0_10 = arith.constant 0 : index
    %37 = vector.load %arg2[%36, %c0_10] : memref<512x32xf32, #tpu.memory_space<vmem>>, vector<1x32xf32>
    %c48_i32 = arith.constant 48 : i32
    %38 = arith.addi %0, %c48_i32 : i32
    %c0_i32_11 = arith.constant 0 : i32
    %39 = arith.addi %38, %c0_i32_11 : i32
    %40 = arith.index_cast %39 : i32 to index
    %41 = memref.load %arg1[%40] : memref<128xi32, #tpu.memory_space<smem>>
    %42 = arith.index_cast %41 : i32 to index
    %c0_12 = arith.constant 0 : index
    %43 = vector.load %arg2[%42, %c0_12] : memref<512x32xf32, #tpu.memory_space<vmem>>, vector<1x32xf32>
    %c56_i32 = arith.constant 56 : i32
    %44 = arith.addi %0, %c56_i32 : i32
    %c0_i32_13 = arith.constant 0 : i32
    %45 = arith.addi %44, %c0_i32_13 : i32
    %46 = arith.index_cast %45 : i32 to index
    %47 = memref.load %arg1[%46] : memref<128xi32, #tpu.memory_space<smem>>
    %48 = arith.index_cast %47 : i32 to index
    %c0_14 = arith.constant 0 : index
    %49 = vector.load %arg2[%48, %c0_14] : memref<512x32xf32, #tpu.memory_space<vmem>>, vector<1x32xf32>
    %50 = tpu.concatenate %7, %13, %19, %25, %31, %37, %43, %49 in 0 : vector<1x32xf32>, vector<1x32xf32>, vector<1x32xf32>, vector<1x32xf32>, vector<1x32xf32>, vector<1x32xf32>, vector<1x32xf32>, vector<1x32xf32> -> vector<8x32xf32>
    %51 = arith.addf %1, %50 : vector<8x32xf32>
    %c0_i32_15 = arith.constant 0 : i32
    %52 = arith.addi %0, %c0_i32_15 : i32
    %c1_i32 = arith.constant 1 : i32
    %53 = arith.addi %52, %c1_i32 : i32
    %54 = arith.index_cast %53 : i32 to index
    %55 = memref.load %arg1[%54] : memref<128xi32, #tpu.memory_space<smem>>
    %56 = arith.index_cast %55 : i32 to index
    %c0_16 = arith.constant 0 : index
    %57 = vector.load %arg2[%56, %c0_16] : memref<512x32xf32, #tpu.memory_space<vmem>>, vector<1x32xf32>
    %c8_i32_17 = arith.constant 8 : i32
    %58 = arith.addi %0, %c8_i32_17 : i32
    %c1_i32_18 = arith.constant 1 : i32
    %59 = arith.addi %58, %c1_i32_18 : i32
    %60 = arith.index_cast %59 : i32 to index
    %61 = memref.load %arg1[%60] : memref<128xi32, #tpu.memory_space<smem>>
    %62 = arith.index_cast %61 : i32 to index
    %c0_19 = arith.constant 0 : index
    %63 = vector.load %arg2[%62, %c0_19] : memref<512x32xf32, #tpu.memory_space<vmem>>, vector<1x32xf32>
    %c16_i32_20 = arith.constant 16 : i32
    %64 = arith.addi %0, %c16_i32_20 : i32
    %c1_i32_21 = arith.constant 1 : i32
    %65 = arith.addi %64, %c1_i32_21 : i32
    %66 = arith.index_cast %65 : i32 to index
    %67 = memref.load %arg1[%66] : memref<128xi32, #tpu.memory_space<smem>>
    %68 = arith.index_cast %67 : i32 to index
    %c0_22 = arith.constant 0 : index
    %69 = vector.load %arg2[%68, %c0_22] : memref<512x32xf32, #tpu.memory_space<vmem>>, vector<1x32xf32>
    %c24_i32_23 = arith.constant 24 : i32
    %70 = arith.addi %0, %c24_i32_23 : i32
    %c1_i32_24 = arith.constant 1 : i32
    %71 = arith.addi %70, %c1_i32_24 : i32
    %72 = arith.index_cast %71 : i32 to index
    %73 = memref.load %arg1[%72] : memref<128xi32, #tpu.memory_space<smem>>
    %74 = arith.index_cast %73 : i32 to index
    %c0_25 = arith.constant 0 : index
    %75 = vector.load %arg2[%74, %c0_25] : memref<512x32xf32, #tpu.memory_space<vmem>>, vector<1x32xf32>
    %c32_i32_26 = arith.constant 32 : i32
    %76 = arith.addi %0, %c32_i32_26 : i32
    %c1_i32_27 = arith.constant 1 : i32
    %77 = arith.addi %76, %c1_i32_27 : i32
    %78 = arith.index_cast %77 : i32 to index
    %79 = memref.load %arg1[%78] : memref<128xi32, #tpu.memory_space<smem>>
    %80 = arith.index_cast %79 : i32 to index
    %c0_28 = arith.constant 0 : index
    %81 = vector.load %arg2[%80, %c0_28] : memref<512x32xf32, #tpu.memory_space<vmem>>, vector<1x32xf32>
    %c40_i32_29 = arith.constant 40 : i32
    %82 = arith.addi %0, %c40_i32_29 : i32
    %c1_i32_30 = arith.constant 1 : i32
    %83 = arith.addi %82, %c1_i32_30 : i32
    %84 = arith.index_cast %83 : i32 to index
    %85 = memref.load %arg1[%84] : memref<128xi32, #tpu.memory_space<smem>>
    %86 = arith.index_cast %85 : i32 to index
    %c0_31 = arith.constant 0 : index
    %87 = vector.load %arg2[%86, %c0_31] : memref<512x32xf32, #tpu.memory_space<vmem>>, vector<1x32xf32>
    %c48_i32_32 = arith.constant 48 : i32
    %88 = arith.addi %0, %c48_i32_32 : i32
    %c1_i32_33 = arith.constant 1 : i32
    %89 = arith.addi %88, %c1_i32_33 : i32
    %90 = arith.index_cast %89 : i32 to index
    %91 = memref.load %arg1[%90] : memref<128xi32, #tpu.memory_space<smem>>
    %92 = arith.index_cast %91 : i32 to index
    %c0_34 = arith.constant 0 : index
    %93 = vector.load %arg2[%92, %c0_34] : memref<512x32xf32, #tpu.memory_space<vmem>>, vector<1x32xf32>
    %c56_i32_35 = arith.constant 56 : i32
    %94 = arith.addi %0, %c56_i32_35 : i32
    %c1_i32_36 = arith.constant 1 : i32
    %95 = arith.addi %94, %c1_i32_36 : i32
    %96 = arith.index_cast %95 : i32 to index
    %97 = memref.load %arg1[%96] : memref<128xi32, #tpu.memory_space<smem>>
    %98 = arith.index_cast %97 : i32 to index
    %c0_37 = arith.constant 0 : index
    %99 = vector.load %arg2[%98, %c0_37] : memref<512x32xf32, #tpu.memory_space<vmem>>, vector<1x32xf32>
    %100 = tpu.concatenate %57, %63, %69, %75, %81, %87, %93, %99 in 0 : vector<1x32xf32>, vector<1x32xf32>, vector<1x32xf32>, vector<1x32xf32>, vector<1x32xf32>, vector<1x32xf32>, vector<1x32xf32>, vector<1x32xf32> -> vector<8x32xf32>
    %101 = arith.addf %51, %100 : vector<8x32xf32>
    %c0_i32_38 = arith.constant 0 : i32
    %102 = arith.addi %0, %c0_i32_38 : i32
    %c2_i32 = arith.constant 2 : i32
    %103 = arith.addi %102, %c2_i32 : i32
    %104 = arith.index_cast %103 : i32 to index
    %105 = memref.load %arg1[%104] : memref<128xi32, #tpu.memory_space<smem>>
    %106 = arith.index_cast %105 : i32 to index
    %c0_39 = arith.constant 0 : index
    %107 = vector.load %arg2[%106, %c0_39] : memref<512x32xf32, #tpu.memory_space<vmem>>, vector<1x32xf32>
    %c8_i32_40 = arith.constant 8 : i32
    %108 = arith.addi %0, %c8_i32_40 : i32
    %c2_i32_41 = arith.constant 2 : i32
    %109 = arith.addi %108, %c2_i32_41 : i32
    %110 = arith.index_cast %109 : i32 to index
    %111 = memref.load %arg1[%110] : memref<128xi32, #tpu.memory_space<smem>>
    %112 = arith.index_cast %111 : i32 to index
    %c0_42 = arith.constant 0 : index
    %113 = vector.load %arg2[%112, %c0_42] : memref<512x32xf32, #tpu.memory_space<vmem>>, vector<1x32xf32>
    %c16_i32_43 = arith.constant 16 : i32
    %114 = arith.addi %0, %c16_i32_43 : i32
    %c2_i32_44 = arith.constant 2 : i32
    %115 = arith.addi %114, %c2_i32_44 : i32
    %116 = arith.index_cast %115 : i32 to index
    %117 = memref.load %arg1[%116] : memref<128xi32, #tpu.memory_space<smem>>
    %118 = arith.index_cast %117 : i32 to index
    %c0_45 = arith.constant 0 : index
    %119 = vector.load %arg2[%118, %c0_45] : memref<512x32xf32, #tpu.memory_space<vmem>>, vector<1x32xf32>
    %c24_i32_46 = arith.constant 24 : i32
    %120 = arith.addi %0, %c24_i32_46 : i32
    %c2_i32_47 = arith.constant 2 : i32
    %121 = arith.addi %120, %c2_i32_47 : i32
    %122 = arith.index_cast %121 : i32 to index
    %123 = memref.load %arg1[%122] : memref<128xi32, #tpu.memory_space<smem>>
    %124 = arith.index_cast %123 : i32 to index
    %c0_48 = arith.constant 0 : index
    %125 = vector.load %arg2[%124, %c0_48] : memref<512x32xf32, #tpu.memory_space<vmem>>, vector<1x32xf32>
    %c32_i32_49 = arith.constant 32 : i32
    %126 = arith.addi %0, %c32_i32_49 : i32
    %c2_i32_50 = arith.constant 2 : i32
    %127 = arith.addi %126, %c2_i32_50 : i32
    %128 = arith.index_cast %127 : i32 to index
    %129 = memref.load %arg1[%128] : memref<128xi32, #tpu.memory_space<smem>>
    %130 = arith.index_cast %129 : i32 to index
    %c0_51 = arith.constant 0 : index
    %131 = vector.load %arg2[%130, %c0_51] : memref<512x32xf32, #tpu.memory_space<vmem>>, vector<1x32xf32>
    %c40_i32_52 = arith.constant 40 : i32
    %132 = arith.addi %0, %c40_i32_52 : i32
    %c2_i32_53 = arith.constant 2 : i32
    %133 = arith.addi %132, %c2_i32_53 : i32
    %134 = arith.index_cast %133 : i32 to index
    %135 = memref.load %arg1[%134] : memref<128xi32, #tpu.memory_space<smem>>
    %136 = arith.index_cast %135 : i32 to index
    %c0_54 = arith.constant 0 : index
    %137 = vector.load %arg2[%136, %c0_54] : memref<512x32xf32, #tpu.memory_space<vmem>>, vector<1x32xf32>
    %c48_i32_55 = arith.constant 48 : i32
    %138 = arith.addi %0, %c48_i32_55 : i32
    %c2_i32_56 = arith.constant 2 : i32
    %139 = arith.addi %138, %c2_i32_56 : i32
    %140 = arith.index_cast %139 : i32 to index
    %141 = memref.load %arg1[%140] : memref<128xi32, #tpu.memory_space<smem>>
    %142 = arith.index_cast %141 : i32 to index
    %c0_57 = arith.constant 0 : index
    %143 = vector.load %arg2[%142, %c0_57] : memref<512x32xf32, #tpu.memory_space<vmem>>, vector<1x32xf32>
    %c56_i32_58 = arith.constant 56 : i32
    %144 = arith.addi %0, %c56_i32_58 : i32
    %c2_i32_59 = arith.constant 2 : i32
    %145 = arith.addi %144, %c2_i32_59 : i32
    %146 = arith.index_cast %145 : i32 to index
    %147 = memref.load %arg1[%146] : memref<128xi32, #tpu.memory_space<smem>>
    %148 = arith.index_cast %147 : i32 to index
    %c0_60 = arith.constant 0 : index
    %149 = vector.load %arg2[%148, %c0_60] : memref<512x32xf32, #tpu.memory_space<vmem>>, vector<1x32xf32>
    %150 = tpu.concatenate %107, %113, %119, %125, %131, %137, %143, %149 in 0 : vector<1x32xf32>, vector<1x32xf32>, vector<1x32xf32>, vector<1x32xf32>, vector<1x32xf32>, vector<1x32xf32>, vector<1x32xf32>, vector<1x32xf32> -> vector<8x32xf32>
    %151 = arith.addf %101, %150 : vector<8x32xf32>
    %c0_i32_61 = arith.constant 0 : i32
    %152 = arith.addi %0, %c0_i32_61 : i32
    %c3_i32 = arith.constant 3 : i32
    %153 = arith.addi %152, %c3_i32 : i32
    %154 = arith.index_cast %153 : i32 to index
    %155 = memref.load %arg1[%154] : memref<128xi32, #tpu.memory_space<smem>>
    %156 = arith.index_cast %155 : i32 to index
    %c0_62 = arith.constant 0 : index
    %157 = vector.load %arg2[%156, %c0_62] : memref<512x32xf32, #tpu.memory_space<vmem>>, vector<1x32xf32>
    %c8_i32_63 = arith.constant 8 : i32
    %158 = arith.addi %0, %c8_i32_63 : i32
    %c3_i32_64 = arith.constant 3 : i32
    %159 = arith.addi %158, %c3_i32_64 : i32
    %160 = arith.index_cast %159 : i32 to index
    %161 = memref.load %arg1[%160] : memref<128xi32, #tpu.memory_space<smem>>
    %162 = arith.index_cast %161 : i32 to index
    %c0_65 = arith.constant 0 : index
    %163 = vector.load %arg2[%162, %c0_65] : memref<512x32xf32, #tpu.memory_space<vmem>>, vector<1x32xf32>
    %c16_i32_66 = arith.constant 16 : i32
    %164 = arith.addi %0, %c16_i32_66 : i32
    %c3_i32_67 = arith.constant 3 : i32
    %165 = arith.addi %164, %c3_i32_67 : i32
    %166 = arith.index_cast %165 : i32 to index
    %167 = memref.load %arg1[%166] : memref<128xi32, #tpu.memory_space<smem>>
    %168 = arith.index_cast %167 : i32 to index
    %c0_68 = arith.constant 0 : index
    %169 = vector.load %arg2[%168, %c0_68] : memref<512x32xf32, #tpu.memory_space<vmem>>, vector<1x32xf32>
    %c24_i32_69 = arith.constant 24 : i32
    %170 = arith.addi %0, %c24_i32_69 : i32
    %c3_i32_70 = arith.constant 3 : i32
    %171 = arith.addi %170, %c3_i32_70 : i32
    %172 = arith.index_cast %171 : i32 to index
    %173 = memref.load %arg1[%172] : memref<128xi32, #tpu.memory_space<smem>>
    %174 = arith.index_cast %173 : i32 to index
    %c0_71 = arith.constant 0 : index
    %175 = vector.load %arg2[%174, %c0_71] : memref<512x32xf32, #tpu.memory_space<vmem>>, vector<1x32xf32>
    %c32_i32_72 = arith.constant 32 : i32
    %176 = arith.addi %0, %c32_i32_72 : i32
    %c3_i32_73 = arith.constant 3 : i32
    %177 = arith.addi %176, %c3_i32_73 : i32
    %178 = arith.index_cast %177 : i32 to index
    %179 = memref.load %arg1[%178] : memref<128xi32, #tpu.memory_space<smem>>
    %180 = arith.index_cast %179 : i32 to index
    %c0_74 = arith.constant 0 : index
    %181 = vector.load %arg2[%180, %c0_74] : memref<512x32xf32, #tpu.memory_space<vmem>>, vector<1x32xf32>
    %c40_i32_75 = arith.constant 40 : i32
    %182 = arith.addi %0, %c40_i32_75 : i32
    %c3_i32_76 = arith.constant 3 : i32
    %183 = arith.addi %182, %c3_i32_76 : i32
    %184 = arith.index_cast %183 : i32 to index
    %185 = memref.load %arg1[%184] : memref<128xi32, #tpu.memory_space<smem>>
    %186 = arith.index_cast %185 : i32 to index
    %c0_77 = arith.constant 0 : index
    %187 = vector.load %arg2[%186, %c0_77] : memref<512x32xf32, #tpu.memory_space<vmem>>, vector<1x32xf32>
    %c48_i32_78 = arith.constant 48 : i32
    %188 = arith.addi %0, %c48_i32_78 : i32
    %c3_i32_79 = arith.constant 3 : i32
    %189 = arith.addi %188, %c3_i32_79 : i32
    %190 = arith.index_cast %189 : i32 to index
    %191 = memref.load %arg1[%190] : memref<128xi32, #tpu.memory_space<smem>>
    %192 = arith.index_cast %191 : i32 to index
    %c0_80 = arith.constant 0 : index
    %193 = vector.load %arg2[%192, %c0_80] : memref<512x32xf32, #tpu.memory_space<vmem>>, vector<1x32xf32>
    %c56_i32_81 = arith.constant 56 : i32
    %194 = arith.addi %0, %c56_i32_81 : i32
    %c3_i32_82 = arith.constant 3 : i32
    %195 = arith.addi %194, %c3_i32_82 : i32
    %196 = arith.index_cast %195 : i32 to index
    %197 = memref.load %arg1[%196] : memref<128xi32, #tpu.memory_space<smem>>
    %198 = arith.index_cast %197 : i32 to index
    %c0_83 = arith.constant 0 : index
    %199 = vector.load %arg2[%198, %c0_83] : memref<512x32xf32, #tpu.memory_space<vmem>>, vector<1x32xf32>
    %200 = tpu.concatenate %157, %163, %169, %175, %181, %187, %193, %199 in 0 : vector<1x32xf32>, vector<1x32xf32>, vector<1x32xf32>, vector<1x32xf32>, vector<1x32xf32>, vector<1x32xf32>, vector<1x32xf32>, vector<1x32xf32> -> vector<8x32xf32>
    %201 = arith.addf %151, %200 : vector<8x32xf32>
    %c0_i32_84 = arith.constant 0 : i32
    %202 = arith.addi %0, %c0_i32_84 : i32
    %c4_i32 = arith.constant 4 : i32
    %203 = arith.addi %202, %c4_i32 : i32
    %204 = arith.index_cast %203 : i32 to index
    %205 = memref.load %arg1[%204] : memref<128xi32, #tpu.memory_space<smem>>
    %206 = arith.index_cast %205 : i32 to index
    %c0_85 = arith.constant 0 : index
    %207 = vector.load %arg2[%206, %c0_85] : memref<512x32xf32, #tpu.memory_space<vmem>>, vector<1x32xf32>
    %c8_i32_86 = arith.constant 8 : i32
    %208 = arith.addi %0, %c8_i32_86 : i32
    %c4_i32_87 = arith.constant 4 : i32
    %209 = arith.addi %208, %c4_i32_87 : i32
    %210 = arith.index_cast %209 : i32 to index
    %211 = memref.load %arg1[%210] : memref<128xi32, #tpu.memory_space<smem>>
    %212 = arith.index_cast %211 : i32 to index
    %c0_88 = arith.constant 0 : index
    %213 = vector.load %arg2[%212, %c0_88] : memref<512x32xf32, #tpu.memory_space<vmem>>, vector<1x32xf32>
    %c16_i32_89 = arith.constant 16 : i32
    %214 = arith.addi %0, %c16_i32_89 : i32
    %c4_i32_90 = arith.constant 4 : i32
    %215 = arith.addi %214, %c4_i32_90 : i32
    %216 = arith.index_cast %215 : i32 to index
    %217 = memref.load %arg1[%216] : memref<128xi32, #tpu.memory_space<smem>>
    %218 = arith.index_cast %217 : i32 to index
    %c0_91 = arith.constant 0 : index
    %219 = vector.load %arg2[%218, %c0_91] : memref<512x32xf32, #tpu.memory_space<vmem>>, vector<1x32xf32>
    %c24_i32_92 = arith.constant 24 : i32
    %220 = arith.addi %0, %c24_i32_92 : i32
    %c4_i32_93 = arith.constant 4 : i32
    %221 = arith.addi %220, %c4_i32_93 : i32
    %222 = arith.index_cast %221 : i32 to index
    %223 = memref.load %arg1[%222] : memref<128xi32, #tpu.memory_space<smem>>
    %224 = arith.index_cast %223 : i32 to index
    %c0_94 = arith.constant 0 : index
    %225 = vector.load %arg2[%224, %c0_94] : memref<512x32xf32, #tpu.memory_space<vmem>>, vector<1x32xf32>
    %c32_i32_95 = arith.constant 32 : i32
    %226 = arith.addi %0, %c32_i32_95 : i32
    %c4_i32_96 = arith.constant 4 : i32
    %227 = arith.addi %226, %c4_i32_96 : i32
    %228 = arith.index_cast %227 : i32 to index
    %229 = memref.load %arg1[%228] : memref<128xi32, #tpu.memory_space<smem>>
    %230 = arith.index_cast %229 : i32 to index
    %c0_97 = arith.constant 0 : index
    %231 = vector.load %arg2[%230, %c0_97] : memref<512x32xf32, #tpu.memory_space<vmem>>, vector<1x32xf32>
    %c40_i32_98 = arith.constant 40 : i32
    %232 = arith.addi %0, %c40_i32_98 : i32
    %c4_i32_99 = arith.constant 4 : i32
    %233 = arith.addi %232, %c4_i32_99 : i32
    %234 = arith.index_cast %233 : i32 to index
    %235 = memref.load %arg1[%234] : memref<128xi32, #tpu.memory_space<smem>>
    %236 = arith.index_cast %235 : i32 to index
    %c0_100 = arith.constant 0 : index
    %237 = vector.load %arg2[%236, %c0_100] : memref<512x32xf32, #tpu.memory_space<vmem>>, vector<1x32xf32>
    %c48_i32_101 = arith.constant 48 : i32
    %238 = arith.addi %0, %c48_i32_101 : i32
    %c4_i32_102 = arith.constant 4 : i32
    %239 = arith.addi %238, %c4_i32_102 : i32
    %240 = arith.index_cast %239 : i32 to index
    %241 = memref.load %arg1[%240] : memref<128xi32, #tpu.memory_space<smem>>
    %242 = arith.index_cast %241 : i32 to index
    %c0_103 = arith.constant 0 : index
    %243 = vector.load %arg2[%242, %c0_103] : memref<512x32xf32, #tpu.memory_space<vmem>>, vector<1x32xf32>
    %c56_i32_104 = arith.constant 56 : i32
    %244 = arith.addi %0, %c56_i32_104 : i32
    %c4_i32_105 = arith.constant 4 : i32
    %245 = arith.addi %244, %c4_i32_105 : i32
    %246 = arith.index_cast %245 : i32 to index
    %247 = memref.load %arg1[%246] : memref<128xi32, #tpu.memory_space<smem>>
    %248 = arith.index_cast %247 : i32 to index
    %c0_106 = arith.constant 0 : index
    %249 = vector.load %arg2[%248, %c0_106] : memref<512x32xf32, #tpu.memory_space<vmem>>, vector<1x32xf32>
    %250 = tpu.concatenate %207, %213, %219, %225, %231, %237, %243, %249 in 0 : vector<1x32xf32>, vector<1x32xf32>, vector<1x32xf32>, vector<1x32xf32>, vector<1x32xf32>, vector<1x32xf32>, vector<1x32xf32>, vector<1x32xf32> -> vector<8x32xf32>
    %251 = arith.addf %201, %250 : vector<8x32xf32>
    %c0_i32_107 = arith.constant 0 : i32
    %252 = arith.addi %0, %c0_i32_107 : i32
    %c5_i32 = arith.constant 5 : i32
    %253 = arith.addi %252, %c5_i32 : i32
    %254 = arith.index_cast %253 : i32 to index
    %255 = memref.load %arg1[%254] : memref<128xi32, #tpu.memory_space<smem>>
    %256 = arith.index_cast %255 : i32 to index
    %c0_108 = arith.constant 0 : index
    %257 = vector.load %arg2[%256, %c0_108] : memref<512x32xf32, #tpu.memory_space<vmem>>, vector<1x32xf32>
    %c8_i32_109 = arith.constant 8 : i32
    %258 = arith.addi %0, %c8_i32_109 : i32
    %c5_i32_110 = arith.constant 5 : i32
    %259 = arith.addi %258, %c5_i32_110 : i32
    %260 = arith.index_cast %259 : i32 to index
    %261 = memref.load %arg1[%260] : memref<128xi32, #tpu.memory_space<smem>>
    %262 = arith.index_cast %261 : i32 to index
    %c0_111 = arith.constant 0 : index
    %263 = vector.load %arg2[%262, %c0_111] : memref<512x32xf32, #tpu.memory_space<vmem>>, vector<1x32xf32>
    %c16_i32_112 = arith.constant 16 : i32
    %264 = arith.addi %0, %c16_i32_112 : i32
    %c5_i32_113 = arith.constant 5 : i32
    %265 = arith.addi %264, %c5_i32_113 : i32
    %266 = arith.index_cast %265 : i32 to index
    %267 = memref.load %arg1[%266] : memref<128xi32, #tpu.memory_space<smem>>
    %268 = arith.index_cast %267 : i32 to index
    %c0_114 = arith.constant 0 : index
    %269 = vector.load %arg2[%268, %c0_114] : memref<512x32xf32, #tpu.memory_space<vmem>>, vector<1x32xf32>
    %c24_i32_115 = arith.constant 24 : i32
    %270 = arith.addi %0, %c24_i32_115 : i32
    %c5_i32_116 = arith.constant 5 : i32
    %271 = arith.addi %270, %c5_i32_116 : i32
    %272 = arith.index_cast %271 : i32 to index
    %273 = memref.load %arg1[%272] : memref<128xi32, #tpu.memory_space<smem>>
    %274 = arith.index_cast %273 : i32 to index
    %c0_117 = arith.constant 0 : index
    %275 = vector.load %arg2[%274, %c0_117] : memref<512x32xf32, #tpu.memory_space<vmem>>, vector<1x32xf32>
    %c32_i32_118 = arith.constant 32 : i32
    %276 = arith.addi %0, %c32_i32_118 : i32
    %c5_i32_119 = arith.constant 5 : i32
    %277 = arith.addi %276, %c5_i32_119 : i32
    %278 = arith.index_cast %277 : i32 to index
    %279 = memref.load %arg1[%278] : memref<128xi32, #tpu.memory_space<smem>>
    %280 = arith.index_cast %279 : i32 to index
    %c0_120 = arith.constant 0 : index
    %281 = vector.load %arg2[%280, %c0_120] : memref<512x32xf32, #tpu.memory_space<vmem>>, vector<1x32xf32>
    %c40_i32_121 = arith.constant 40 : i32
    %282 = arith.addi %0, %c40_i32_121 : i32
    %c5_i32_122 = arith.constant 5 : i32
    %283 = arith.addi %282, %c5_i32_122 : i32
    %284 = arith.index_cast %283 : i32 to index
    %285 = memref.load %arg1[%284] : memref<128xi32, #tpu.memory_space<smem>>
    %286 = arith.index_cast %285 : i32 to index
    %c0_123 = arith.constant 0 : index
    %287 = vector.load %arg2[%286, %c0_123] : memref<512x32xf32, #tpu.memory_space<vmem>>, vector<1x32xf32>
    %c48_i32_124 = arith.constant 48 : i32
    %288 = arith.addi %0, %c48_i32_124 : i32
    %c5_i32_125 = arith.constant 5 : i32
    %289 = arith.addi %288, %c5_i32_125 : i32
    %290 = arith.index_cast %289 : i32 to index
    %291 = memref.load %arg1[%290] : memref<128xi32, #tpu.memory_space<smem>>
    %292 = arith.index_cast %291 : i32 to index
    %c0_126 = arith.constant 0 : index
    %293 = vector.load %arg2[%292, %c0_126] : memref<512x32xf32, #tpu.memory_space<vmem>>, vector<1x32xf32>
    %c56_i32_127 = arith.constant 56 : i32
    %294 = arith.addi %0, %c56_i32_127 : i32
    %c5_i32_128 = arith.constant 5 : i32
    %295 = arith.addi %294, %c5_i32_128 : i32
    %296 = arith.index_cast %295 : i32 to index
    %297 = memref.load %arg1[%296] : memref<128xi32, #tpu.memory_space<smem>>
    %298 = arith.index_cast %297 : i32 to index
    %c0_129 = arith.constant 0 : index
    %299 = vector.load %arg2[%298, %c0_129] : memref<512x32xf32, #tpu.memory_space<vmem>>, vector<1x32xf32>
    %300 = tpu.concatenate %257, %263, %269, %275, %281, %287, %293, %299 in 0 : vector<1x32xf32>, vector<1x32xf32>, vector<1x32xf32>, vector<1x32xf32>, vector<1x32xf32>, vector<1x32xf32>, vector<1x32xf32>, vector<1x32xf32> -> vector<8x32xf32>
    %301 = arith.addf %251, %300 : vector<8x32xf32>
    %c0_i32_130 = arith.constant 0 : i32
    %302 = arith.addi %0, %c0_i32_130 : i32
    %c6_i32 = arith.constant 6 : i32
    %303 = arith.addi %302, %c6_i32 : i32
    %304 = arith.index_cast %303 : i32 to index
    %305 = memref.load %arg1[%304] : memref<128xi32, #tpu.memory_space<smem>>
    %306 = arith.index_cast %305 : i32 to index
    %c0_131 = arith.constant 0 : index
    %307 = vector.load %arg2[%306, %c0_131] : memref<512x32xf32, #tpu.memory_space<vmem>>, vector<1x32xf32>
    %c8_i32_132 = arith.constant 8 : i32
    %308 = arith.addi %0, %c8_i32_132 : i32
    %c6_i32_133 = arith.constant 6 : i32
    %309 = arith.addi %308, %c6_i32_133 : i32
    %310 = arith.index_cast %309 : i32 to index
    %311 = memref.load %arg1[%310] : memref<128xi32, #tpu.memory_space<smem>>
    %312 = arith.index_cast %311 : i32 to index
    %c0_134 = arith.constant 0 : index
    %313 = vector.load %arg2[%312, %c0_134] : memref<512x32xf32, #tpu.memory_space<vmem>>, vector<1x32xf32>
    %c16_i32_135 = arith.constant 16 : i32
    %314 = arith.addi %0, %c16_i32_135 : i32
    %c6_i32_136 = arith.constant 6 : i32
    %315 = arith.addi %314, %c6_i32_136 : i32
    %316 = arith.index_cast %315 : i32 to index
    %317 = memref.load %arg1[%316] : memref<128xi32, #tpu.memory_space<smem>>
    %318 = arith.index_cast %317 : i32 to index
    %c0_137 = arith.constant 0 : index
    %319 = vector.load %arg2[%318, %c0_137] : memref<512x32xf32, #tpu.memory_space<vmem>>, vector<1x32xf32>
    %c24_i32_138 = arith.constant 24 : i32
    %320 = arith.addi %0, %c24_i32_138 : i32
    %c6_i32_139 = arith.constant 6 : i32
    %321 = arith.addi %320, %c6_i32_139 : i32
    %322 = arith.index_cast %321 : i32 to index
    %323 = memref.load %arg1[%322] : memref<128xi32, #tpu.memory_space<smem>>
    %324 = arith.index_cast %323 : i32 to index
    %c0_140 = arith.constant 0 : index
    %325 = vector.load %arg2[%324, %c0_140] : memref<512x32xf32, #tpu.memory_space<vmem>>, vector<1x32xf32>
    %c32_i32_141 = arith.constant 32 : i32
    %326 = arith.addi %0, %c32_i32_141 : i32
    %c6_i32_142 = arith.constant 6 : i32
    %327 = arith.addi %326, %c6_i32_142 : i32
    %328 = arith.index_cast %327 : i32 to index
    %329 = memref.load %arg1[%328] : memref<128xi32, #tpu.memory_space<smem>>
    %330 = arith.index_cast %329 : i32 to index
    %c0_143 = arith.constant 0 : index
    %331 = vector.load %arg2[%330, %c0_143] : memref<512x32xf32, #tpu.memory_space<vmem>>, vector<1x32xf32>
    %c40_i32_144 = arith.constant 40 : i32
    %332 = arith.addi %0, %c40_i32_144 : i32
    %c6_i32_145 = arith.constant 6 : i32
    %333 = arith.addi %332, %c6_i32_145 : i32
    %334 = arith.index_cast %333 : i32 to index
    %335 = memref.load %arg1[%334] : memref<128xi32, #tpu.memory_space<smem>>
    %336 = arith.index_cast %335 : i32 to index
    %c0_146 = arith.constant 0 : index
    %337 = vector.load %arg2[%336, %c0_146] : memref<512x32xf32, #tpu.memory_space<vmem>>, vector<1x32xf32>
    %c48_i32_147 = arith.constant 48 : i32
    %338 = arith.addi %0, %c48_i32_147 : i32
    %c6_i32_148 = arith.constant 6 : i32
    %339 = arith.addi %338, %c6_i32_148 : i32
    %340 = arith.index_cast %339 : i32 to index
    %341 = memref.load %arg1[%340] : memref<128xi32, #tpu.memory_space<smem>>
    %342 = arith.index_cast %341 : i32 to index
    %c0_149 = arith.constant 0 : index
    %343 = vector.load %arg2[%342, %c0_149] : memref<512x32xf32, #tpu.memory_space<vmem>>, vector<1x32xf32>
    %c56_i32_150 = arith.constant 56 : i32
    %344 = arith.addi %0, %c56_i32_150 : i32
    %c6_i32_151 = arith.constant 6 : i32
    %345 = arith.addi %344, %c6_i32_151 : i32
    %346 = arith.index_cast %345 : i32 to index
    %347 = memref.load %arg1[%346] : memref<128xi32, #tpu.memory_space<smem>>
    %348 = arith.index_cast %347 : i32 to index
    %c0_152 = arith.constant 0 : index
    %349 = vector.load %arg2[%348, %c0_152] : memref<512x32xf32, #tpu.memory_space<vmem>>, vector<1x32xf32>
    %350 = tpu.concatenate %307, %313, %319, %325, %331, %337, %343, %349 in 0 : vector<1x32xf32>, vector<1x32xf32>, vector<1x32xf32>, vector<1x32xf32>, vector<1x32xf32>, vector<1x32xf32>, vector<1x32xf32>, vector<1x32xf32> -> vector<8x32xf32>
    %351 = arith.addf %301, %350 : vector<8x32xf32>
    %c0_i32_153 = arith.constant 0 : i32
    %352 = arith.addi %0, %c0_i32_153 : i32
    %c7_i32 = arith.constant 7 : i32
    %353 = arith.addi %352, %c7_i32 : i32
    %354 = arith.index_cast %353 : i32 to index
    %355 = memref.load %arg1[%354] : memref<128xi32, #tpu.memory_space<smem>>
    %356 = arith.index_cast %355 : i32 to index
    %c0_154 = arith.constant 0 : index
    %357 = vector.load %arg2[%356, %c0_154] : memref<512x32xf32, #tpu.memory_space<vmem>>, vector<1x32xf32>
    %c8_i32_155 = arith.constant 8 : i32
    %358 = arith.addi %0, %c8_i32_155 : i32
    %c7_i32_156 = arith.constant 7 : i32
    %359 = arith.addi %358, %c7_i32_156 : i32
    %360 = arith.index_cast %359 : i32 to index
    %361 = memref.load %arg1[%360] : memref<128xi32, #tpu.memory_space<smem>>
    %362 = arith.index_cast %361 : i32 to index
    %c0_157 = arith.constant 0 : index
    %363 = vector.load %arg2[%362, %c0_157] : memref<512x32xf32, #tpu.memory_space<vmem>>, vector<1x32xf32>
    %c16_i32_158 = arith.constant 16 : i32
    %364 = arith.addi %0, %c16_i32_158 : i32
    %c7_i32_159 = arith.constant 7 : i32
    %365 = arith.addi %364, %c7_i32_159 : i32
    %366 = arith.index_cast %365 : i32 to index
    %367 = memref.load %arg1[%366] : memref<128xi32, #tpu.memory_space<smem>>
    %368 = arith.index_cast %367 : i32 to index
    %c0_160 = arith.constant 0 : index
    %369 = vector.load %arg2[%368, %c0_160] : memref<512x32xf32, #tpu.memory_space<vmem>>, vector<1x32xf32>
    %c24_i32_161 = arith.constant 24 : i32
    %370 = arith.addi %0, %c24_i32_161 : i32
    %c7_i32_162 = arith.constant 7 : i32
    %371 = arith.addi %370, %c7_i32_162 : i32
    %372 = arith.index_cast %371 : i32 to index
    %373 = memref.load %arg1[%372] : memref<128xi32, #tpu.memory_space<smem>>
    %374 = arith.index_cast %373 : i32 to index
    %c0_163 = arith.constant 0 : index
    %375 = vector.load %arg2[%374, %c0_163] : memref<512x32xf32, #tpu.memory_space<vmem>>, vector<1x32xf32>
    %c32_i32_164 = arith.constant 32 : i32
    %376 = arith.addi %0, %c32_i32_164 : i32
    %c7_i32_165 = arith.constant 7 : i32
    %377 = arith.addi %376, %c7_i32_165 : i32
    %378 = arith.index_cast %377 : i32 to index
    %379 = memref.load %arg1[%378] : memref<128xi32, #tpu.memory_space<smem>>
    %380 = arith.index_cast %379 : i32 to index
    %c0_166 = arith.constant 0 : index
    %381 = vector.load %arg2[%380, %c0_166] : memref<512x32xf32, #tpu.memory_space<vmem>>, vector<1x32xf32>
    %c40_i32_167 = arith.constant 40 : i32
    %382 = arith.addi %0, %c40_i32_167 : i32
    %c7_i32_168 = arith.constant 7 : i32
    %383 = arith.addi %382, %c7_i32_168 : i32
    %384 = arith.index_cast %383 : i32 to index
    %385 = memref.load %arg1[%384] : memref<128xi32, #tpu.memory_space<smem>>
    %386 = arith.index_cast %385 : i32 to index
    %c0_169 = arith.constant 0 : index
    %387 = vector.load %arg2[%386, %c0_169] : memref<512x32xf32, #tpu.memory_space<vmem>>, vector<1x32xf32>
    %c48_i32_170 = arith.constant 48 : i32
    %388 = arith.addi %0, %c48_i32_170 : i32
    %c7_i32_171 = arith.constant 7 : i32
    %389 = arith.addi %388, %c7_i32_171 : i32
    %390 = arith.index_cast %389 : i32 to index
    %391 = memref.load %arg1[%390] : memref<128xi32, #tpu.memory_space<smem>>
    %392 = arith.index_cast %391 : i32 to index
    %c0_172 = arith.constant 0 : index
    %393 = vector.load %arg2[%392, %c0_172] : memref<512x32xf32, #tpu.memory_space<vmem>>, vector<1x32xf32>
    %c56_i32_173 = arith.constant 56 : i32
    %394 = arith.addi %0, %c56_i32_173 : i32
    %c7_i32_174 = arith.constant 7 : i32
    %395 = arith.addi %394, %c7_i32_174 : i32
    %396 = arith.index_cast %395 : i32 to index
    %397 = memref.load %arg1[%396] : memref<128xi32, #tpu.memory_space<smem>>
    %398 = arith.index_cast %397 : i32 to index
    %c0_175 = arith.constant 0 : index
    %399 = vector.load %arg2[%398, %c0_175] : memref<512x32xf32, #tpu.memory_space<vmem>>, vector<1x32xf32>
    %400 = tpu.concatenate %357, %363, %369, %375, %381, %387, %393, %399 in 0 : vector<1x32xf32>, vector<1x32xf32>, vector<1x32xf32>, vector<1x32xf32>, vector<1x32xf32>, vector<1x32xf32>, vector<1x32xf32>, vector<1x32xf32> -> vector<8x32xf32>
    %401 = arith.addf %351, %400 : vector<8x32xf32>
    %c0_176 = arith.constant 0 : index
    %c0_177 = arith.constant 0 : index
    %402 = vector.load %arg3[%c0_176, %c0_177] : memref<8x1xf32, #tpu.memory_space<vmem>>, vector<8x1xf32>
    %cst_178 = arith.constant 1.000000e+00 : f32
    %403 = vector.broadcast %cst_178 : f32 to vector<8x1xf32>
    %404 = arith.divf %403, %402 : vector<8x1xf32>
    %405 = vector.broadcast %404 : vector<8x1xf32> to vector<8x32xf32>
    %406 = arith.mulf %401, %405 : vector<8x32xf32>
    %c0_179 = arith.constant 0 : index
    %c0_180 = arith.constant 0 : index
    %407 = vector.load %arg4[%c0_179, %c0_180] : memref<32x128xf32, #tpu.memory_space<vmem>>, vector<32x128xf32>
    %cst_181 = arith.constant dense<0.000000e+00> : vector<8x128xf32>
    %408 = tpu.matmul %406, %407, %cst_181 {dimension_numbers = #tpu.dot_dimension_numbers<[1], [0], [0], [1], [0, 0, 1, 1], [], []>} : vector<8x32xf32>, vector<32x128xf32>, vector<8x128xf32> -> vector<8x128xf32>
    %c0_182 = arith.constant 0 : index
    %c0_183 = arith.constant 0 : index
    %409 = vector.load %arg5[%c0_182, %c0_183] : memref<1x128xf32, #tpu.memory_space<vmem>>, vector<1x128xf32>
    %410 = vector.broadcast %409 : vector<1x128xf32> to vector<8x128xf32>
    %411 = arith.addf %408, %410 : vector<8x128xf32>
    %c0_184 = arith.constant 0 : index
    %c0_185 = arith.constant 0 : index
    %412 = vector.load %arg6[%c0_184, %c0_185] : memref<8x128xf32, #tpu.memory_space<vmem>>, vector<8x128xf32>
    tpu.vector_store %arg6[%c0_184, %c0_185], %411 {strides = array<i32>} : memref<8x128xf32, #tpu.memory_space<vmem>>, vector<8x128xf32>,
    return
  }
  func.func @transform_0(%arg0: i32, %arg1: memref<128xi32, #tpu.memory_space<smem>>) -> (i32, i32) {
    %c0_i32 = arith.constant 0 : i32
    %c0_i32_0 = arith.constant 0 : i32
    %c0_i32_1 = arith.constant 0 : i32
    return %c0_i32, %c0_i32_0 : i32, i32
  }
  func.func @transform_1(%arg0: i32, %arg1: memref<128xi32, #tpu.memory_space<smem>>) -> (i32, i32) {
    %c0_i32 = arith.constant 0 : i32
    %c0_i32_0 = arith.constant 0 : i32
    return %arg0, %c0_i32 : i32, i32
  }
  func.func @transform_2(%arg0: i32, %arg1: memref<128xi32, #tpu.memory_space<smem>>) -> (i32, i32) {
    %c0_i32 = arith.constant 0 : i32
    %c0_i32_0 = arith.constant 0 : i32
    %c0_i32_1 = arith.constant 0 : i32
    return %c0_i32, %c0_i32_0 : i32, i32
  }
  func.func @transform_3(%arg0: i32, %arg1: memref<128xi32, #tpu.memory_space<smem>>) -> (i32, i32) {
    %c0_i32 = arith.constant 0 : i32
    %c0_i32_0 = arith.constant 0 : i32
    %c0_i32_1 = arith.constant 0 : i32
    return %c0_i32, %c0_i32_0 : i32, i32
  }
  func.func @transform_4(%arg0: i32, %arg1: memref<128xi32, #tpu.memory_space<smem>>) -> (i32, i32) {
    %c0_i32 = arith.constant 0 : i32
    %c0_i32_0 = arith.constant 0 : i32
    return %arg0, %c0_i32 : i32, i32
  }
}

</mosaic_0001>

<bundles_post_ra>
// kernel: tpu_custom_call.1
= control target key start
LH: loop header
LB: loop body
LE: loop exit
PB: predicated region body
PF: predicated region fallthrough
CT: control target
= control target key end

     0   :  { %s1026_s21 = smov [#allocation3]   ;;  %s1961_s0 = inlined_call_operand.vmem [shape: s32[128], index: 0, kind: input, shape index: {}]   ;;  %s1962_s1 = inlined_call_operand.vmem [shape: f32[512,32], index: 1, kind: input, shape index: {}]   ;;  %s1963_s2 = inlined_call_operand.vmem [shape: f32[16,1], index: 2, kind: input, shape index: {}]   ;;  %s1964_s3 = inlined_call_operand.vmem [shape: f32[32,128], index: 3, kind: input, shape index: {}]   ;;  %s1965_s4 = inlined_call_operand.vmem [shape: f32[1,128], index: 4, kind: input, shape index: {}]   ;;  %s1966_s5 = inlined_call_operand.hbm [shape: f32[16,128], index: 5, kind: output, shape index: {}]  }
   0x1   :  { %2014 = sst [smem:[#allocation50_spill]] %s1963_s2  ;;  %s11_s20 = sshll.u32 %s1961_s0, 4  ;;  %s12_s20 = int_to_ptr.vmem [resolvable:$true] %s11_s20 }
   0x2   :  { %2015 = sst [smem:[#allocation51_spill]] %s1964_s3 }
   0x3   :  { %2016 = sst [smem:[#allocation52_spill]] %s1965_s4 }
   0x4   :  { %2017 = sst [smem:[#allocation53_spill]] %s1966_s5 }
   0x5   :  { %14 = dma.vmem_to_smem %s12_s20, 16, %s1026_s21, [#allocation2] }
   0x6   :  { %1004 = dma.done.wait [#allocation2], 16 }
   0x7   :  { %1005 = vsyncadd [#allocation2], 4294967280 }
   0x8   :  { %17 = sfence }
   0x9   :  { %18 = vsyncpa [#allocation5], 0 }
   0xa   :  { %20 = vsyncpa [#allocation5 + $0x1], 0  ;;  %s1061_s22 = smov 0   ;;  %s1063_s23 = smov 0  }
   0xb   :  { %s1065_s24 = smov 0   ;;  %s1067_s25 = smov 0  }
   0xc LB: > { %2018 = sst [smem:[#allocation8_spill]] %s1012_s22  ;;  %s1082_s0 = sadd.s32 4294967295, %s1024_s25   ;;  %s1024_s25 = sphi %s1067_s25, %s2162_s25   ;;  %s1020_s24 = sphi %s1065_s24, %s2165_s24   ;;  %s1016_s23 = sphi %s1063_s23, %s2164_s23   ;;  %s1012_s22 = sphi %s1061_s22, %s2163_s22  }
   0xd   : > { %2019 = sst [smem:[#allocation9_spill]] %s1016_s23  ;;  %s891_s26 = sadd.s32 4294967294, %s1024_s25  }
   0xe   : > { %2020 = sst [smem:[#allocation10_spill]] %s1020_s24  ;;  %s1086_s27 = sadd.s32 1, %s1024_s25  }
   0xf   : > { %2021 = sst [smem:[#allocation11_spill]] %s1024_s25  ;;  %s122_s28 = sadd.s32 1, %s1020_s24 }
  0x10   : > { %2022 = sst [smem:[#allocation12_spill]] %s1082_s0  ;;  %s119_s29 = ssub.s32 %s1024_s25, %s1086_s27 }
  0x11   : > { %2023 = sst [smem:[#allocation13_spill]] %s1086_s27  ;;  %p132_p0 = scmp.ne.s32.totalorder %s1020_s24, %s1016_s23 }
  0x12   : > { %p120_p1 = scmp.eq.s32.totalorder %s119_s29, 0  ;;  %p133_p2 = scmp.eq.s32.totalorder %s1082_s0, 1 }
  0x13   : > { %p138_p3 = scmp.ne.s32.totalorder %s1016_s23, %s1012_s22  ;;  %p139_p4 = scmp.eq.s32.totalorder %s891_s26, 1 }
  0x14   : > { %s1097_s30 = scalar_select %p120_p1, %s1020_s24, %s122_s28  }
  0x15   : > { %p1099_p5 = por %p133_p2, %p132_p0  ;;  %p1103_p6 = por %p139_p4, %p138_p3 }
  0x16   : > { %2024 = sst [smem:[#allocation14_spill]] %s1097_s30  ;;  %p894_p7 = scmp.ge.s32.totalorder %s1024_s25, 1 }
  0x17   : > { %s2025_s6 = scalar_select %p1099_p5, 1, 0 }
  0x18   : > { %s2027_s7 = scalar_select %p1103_p6, 1, 0 }
  0x19   : > { %2026 = sst [smem:[#allocation15_spill]] %s2025_s6  ;;  %p173_p8 = scmp.lt.s32.totalorder %s1024_s25, 3 }
  0x1a   : > { %2028 = sst [smem:[#allocation16_spill]] %s2027_s7 }
  0x1b   : > { %p174_p9 = pnand %p894_p7, %p173_p8 }
  0x1d   : > { %177 = sbr.rel (%p174_p9) target bundleno = 332 (0x14c), region = 36 }
  0x22   : > { %p198_p10 = scmp.lt.s32.totalorder %s1082_s0, 1  ;;  %s2029_s3 = sld [smem:[#allocation51_spill]]  ;;  %v1027_v2 = vmov 0   ;;  %vm255_vm4 = vcmask 1040384   ;;  %vm257_vm5 = vcmask 1041408   ;;  %vm259_vm6 = vcmask 1042432  }
  0x23   : > { %944 = vset.pattern.permute.xlu0 %v1027_v2  ;;  %s2030_s2 = sld [smem:[#allocation50_spill]]  ;;  %s1124_s19 = sshll.u32 %s1082_s0, 6  ;;  %vm261_vm7 = vcmask 1043456   ;;  %vm263_vm8 = vcmask 1044480   ;;  %vm265_vm9 = vcmask 1045504   ;;  %vm267_vm10 = vcmask 1046528  }
  0x24   : > { %s199_s12 = scalar_select %p198_p10, %s1082_s0, 1  ;;  %vm727_vm11 = vcmask 261120  }
  0x25   : > { %s206_s20 = sadd.s32 8, %s1124_s19  ;;  %s1128_s21 = sld [smem:[#allocation3 + %s1124_s19]] }
  0x26   : > { %s896_s15 = sshll.u32 %s199_s12, 3  ;;  %s210_s26 = sadd.s32 16, %s1124_s19 }
  0x27   : > { %s1131_s28 = sld [smem:[#allocation3 + %s206_s20]]  ;;  %s214_s29 = sadd.s32 24, %s1124_s19 }
  0x28   : > { %v722_v0 = vld [vmem:[%s2029_s3 + $0x18] sm:$0xff]  ;;  %v721_v1 = vld [vmem:[%s2029_s3 + $0x10] sm:$0xff]  ;;  %v720_v3 = vld [vmem:[%s2029_s3 + $0x8] sm:$0xff]  ;;  %s1134_s8 = sld [smem:[#allocation3 + %s210_s26]]  ;;  %s218_s10 = sadd.s32 32, %s1124_s19 }
  0x29   : > { %743 = vmatpush.msra.mxu0 %v722_v0  ;;  %s201_s18 = scalar_lea.vmem %s2030_s2, %s896_s15  ;;  %s1136_s9 = sld [smem:[#allocation3 + %s214_s29]] }
  0x2a   : > { %v697_v4 = vld [vmem:[%s201_s18] sm:$0xff]  ;;  %s222_s11 = sadd.s32 40, %s1124_s19  ;;  %s1144_s15 = sld [smem:[#allocation3 + %s218_s10]] }
  0x2b   : > { %744 = vmatpush.msra.mxu0 %v721_v1  ;;  %946 = vrcp.f32 %v697_v4  ;;  %v709_v7 = vand.u32 2147483648, %v697_v4  ;;  %vm703_vm0 = vweird.f32 %v697_v4  ;;  %v707_v9 = vand.u32 2147483647, %v697_v4  ;;  %s226_s16 = sadd.s32 48, %s1124_s19  ;;  %s1151_s26 = sld [smem:[#allocation3 + %s222_s11]] }
  0x2c   : > { %s230_s24 = sadd.s32 56, %s1124_s19  ;;  %s1158_s12 = sld [smem:[#allocation3 + %s226_s16]] }
  0x2d   : > { %745 = vmatpush.msra.mxu0 %v720_v3  ;;  %v710_v11 = vor.u32 1.1754944e-38, %v709_v7  ;;  %vm708_vm3 = vcmp.eq.f32.partialorder %v707_v9, 8.507059e+37  ;;  %s270_s13 = sadd.s32 1, %s1124_s19  ;;  %s274_s17 = sadd.s32 9, %s1124_s19 }
  0x2e   : > { %s1166_s18 = sld [smem:[#allocation3 + %s230_s24]]  ;;  %s278_s11 = sadd.s32 17, %s1124_s19 }
  0x2f   : > { %2031 = sst [smem:[#allocation17_spill]] %s1136_s9  ;;  %s282_s29 = sadd.s32 25, %s1124_s19 }
  0x30   : > { %2032 = sst [smem:[#allocation18_spill]] %s1144_s15  ;;  %s286_s16 = sadd.s32 33, %s1124_s19 }
  0x31   : > { %v947_v5 = vpop.eup %946  ;;  %s1169_s2 = sld [smem:[#allocation3 + %s270_s13]]  ;;  %s290_s14 = sadd.s32 41, %s1124_s19 }
  0x32   : > { %v699_v6 = vmul.f32 %v947_v5, %v697_v4  ;;  %vm704_vm1 = vweird.f32 %v947_v5  ;;  %2033 = sst [smem:[#allocation19_spill]] %s1158_s12  ;;  %s294_s24 = sadd.s32 49, %s1124_s19 }
  0x33   : > { %vm705_vm2 = vmor %vm703_vm0, %vm704_vm1  ;;  %s1172_s30 = sld [smem:[#allocation3 + %s274_s17]]  ;;  %s339_s15 = sadd.s32 18, %s1124_s19 }
  0x34   : > { %v700_v8 = vsub.f32 1.0, %v699_v6  ;;  %2034 = sst [smem:[#allocation20_spill]] %s1166_s18  ;;  %s343_s27 = sadd.s32 26, %s1124_s19 }
  0x35   : > { %s1175_s20 = sld [smem:[#allocation3 + %s278_s11]]  ;;  %s298_s11 = sadd.s32 57, %s1124_s19 }
  0x36   : > { %v701_v10 = vmul.f32 %v947_v5, %v700_v8  ;;  %s1178_s10 = sld [smem:[#allocation3 + %s282_s29]]  ;;  %s331_s29 = sadd.s32 2, %s1124_s19 }
  0x37   : > { %2035 = sst [smem:[#allocation21_spill]] %s1169_s2  ;;  %s347_s0 = sadd.s32 34, %s1124_s19 }
  0x38   : > { %v702_v12 = vadd.f32 %v947_v5, %v701_v10  ;;  %s1185_s22 = sld [smem:[#allocation3 + %s286_s16]]  ;;  %s351_s7 = sadd.s32 42, %s1124_s19 }
  0x39   : > { %s1187_s17 = sld [smem:[#allocation3 + %s290_s14]]  ;;  %s335_s14 = sadd.s32 10, %s1124_s19 }
  0x3a   : > { %v706_v13 = vsel %vm705_vm2, %v947_v5, %v702_v12  ;;  %s1190_s25 = sld [smem:[#allocation3 + %s294_s24]]  ;;  %s396_s6 = sadd.s32 11, %s1124_s19 }
  0x3b   : > { %v711_v14 = vsel %vm708_vm3, %v710_v11, %v706_v13  ;;  %s1201_s13 = sld [smem:[#allocation3 + %s298_s11]]  ;;  %s400_s24 = sadd.s32 19, %s1124_s19 }
  0x3c   : > { %715 = vperm.xlu0 %944, %v711_v14   ;;  %2036 = sst [smem:[#allocation22_spill]] %s1178_s10  ;;  %s359_s10 = sadd.s32 58, %s1124_s19 }
  0x3d   : > { %s1208_s3 = sld [smem:[#allocation3 + %s331_s29]]  ;;  %s404_s16 = sadd.s32 27, %s1124_s19 }
  0x3e   : > { %2037 = sst [smem:[#allocation23_spill]] %s1185_s22  ;;  %s461_s2 = sadd.s32 20, %s1124_s19 }
  0x3f   : > { %2038 = sst [smem:[#allocation24_spill]] %s1187_s17 }
  0x40   : > { %2039 = sst [smem:[#allocation25_spill]] %s1190_s25  ;;  %s408_s25 = sadd.s32 35, %s1124_s19 }
  0x41   : > { %2040 = sst [smem:[#allocation26_spill]] %s1201_s13 }
  0x42   : > { %s1222_s12 = sld [smem:[#allocation3 + %s335_s14]] }
  0x43   : > { %2041 = sst [smem:[#allocation27_spill]] %s1208_s3  ;;  %s453_s3 = sadd.s32 4, %s1124_s19 }
  0x44   : > { %s1242_s23 = sld [smem:[#allocation3 + %s339_s15]]  ;;  %s355_s15 = sadd.s32 50, %s1124_s19 }
  0x45   : > { %s1249_s29 = sld [smem:[#allocation3 + %s343_s27]]  ;;  %s392_s27 = sadd.s32 3, %s1124_s19 }
  0x46   : > { %s1256_s14 = sld [smem:[#allocation3 + %s347_s0]] }
  0x47   : > { %s1264_s9 = sld [smem:[#allocation3 + %s351_s7]] }
  0x48   : > { %2042 = sst [smem:[#allocation28_spill]] %s1222_s12 }
  0x49   : > { %s1267_s22 = sld [smem:[#allocation3 + %s355_s15]] }
  0x4a   : > { %2043 = sst [smem:[#allocation29_spill]] %s1242_s23 }
  0x4b   : > { %2044 = sst [smem:[#allocation30_spill]] %s1249_s29  ;;  %s457_s29 = sadd.s32 12, %s1124_s19 }
  0x4c   : > { %2045 = sst [smem:[#allocation31_spill]] %s1256_s14  ;;  %s420_s14 = sadd.s32 59, %s1124_s19 }
  0x4d   : > { %2046 = sst [smem:[#allocation32_spill]] %s1264_s9 }
  0x4e   : > { %s1270_s0 = sld [smem:[#allocation3 + %s359_s10]] }
  0x4f   : > { %2047 = sst [smem:[#allocation33_spill]] %s1267_s22  ;;  %s2068_s22 = scalar_lea.vmem %s1962_s1, %s1128_s21 }
  0x50   : > { %s1277_s11 = sld [smem:[#allocation3 + %s392_s27]]  ;;  %v205_v17 = vld [vmem:[%s2068_s22] sm:$0x1] }
  0x51   : > { %s1279_s7 = sld [smem:[#allocation3 + %s396_s6]]  ;;  %s412_s6 = sadd.s32 43, %s1124_s19 }
  0x52   : > { %s1282_s15 = sld [smem:[#allocation3 + %s400_s24]]  ;;  %s416_s24 = sadd.s32 51, %s1124_s19 }
  0x53   : > { %s1293_s27 = sld [smem:[#allocation3 + %s404_s16]] }
  0x54   : > { %2048 = sst [smem:[#allocation34_spill]] %s1270_s0 }
  0x55   : > { %s1296_s5 = sld [smem:[#allocation3 + %s408_s25]] }
  0x56   : > { %2049 = sst [smem:[#allocation35_spill]] %s1277_s11 }
  0x57   : > { %2050 = sst [smem:[#allocation36_spill]] %s1279_s7  ;;  %s2065_s7 = scalar_lea.vmem %s1962_s1, %s1131_s28 }
  0x58   : > { %2051 = sst [smem:[#allocation37_spill]] %s1282_s15  ;;  %v209_v15 = vld [vmem:[%s2065_s7] sm:$0x1]  ;;  %s530_s28 = sadd.s32 37, %s1124_s19 }
  0x59   : > { %2052 = sst [smem:[#allocation38_spill]] %s1293_s27  ;;  %v235_v20 = vrot.slane %v209_v15, 7 }
  0x5a   : > { %s1311_s4 = sld [smem:[#allocation3 + %s412_s6]]  ;;  %s481_s6 = sadd.s32 60, %s1124_s19 }
  0x5b   : > { %2053 = sst [smem:[#allocation39_spill]] %s1296_s5  ;;  %v256_v31 = vsel %vm255_vm4, %v205_v17, %v235_v20 }
  0x5c   : > { %s1313_s25 = sld [smem:[#allocation3 + %s416_s24]] }
  0x5d   : > { %s1329_s24 = sld [smem:[#allocation3 + %s420_s14]]  ;;  %s465_s14 = sadd.s32 28, %s1124_s19 }
  0x5e   : > { %s1332_s0 = sld [smem:[#allocation3 + %s453_s3]]  ;;  %s469_s3 = sadd.s32 36, %s1124_s19 }
  0x5f   : > { %s1343_s16 = sld [smem:[#allocation3 + %s457_s29]]  ;;  %s473_s29 = sadd.s32 44, %s1124_s19 }
  0x60   : > { %2054 = sst [smem:[#allocation40_spill]] %s1311_s4 }
  0x61   : > { %s1346_s13 = sld [smem:[#allocation3 + %s461_s2]]  ;;  %s477_s2 = sadd.s32 52, %s1124_s19 }
  0x62   : > { %2055 = sst [smem:[#allocation41_spill]] %s1313_s25  ;;  %s518_s25 = sadd.s32 13, %s1124_s19 }
  0x63   : > { %2056 = sst [smem:[#allocation42_spill]] %s1329_s24 }
  0x64   : > { %2057 = sst [smem:[#allocation43_spill]] %s1332_s0  ;;  %s526_s0 = sadd.s32 29, %s1124_s19 }
  0x65   : > { %2058 = sst [smem:[#allocation44_spill]] %s1343_s16  ;;  %s2067_s16 = scalar_lea.vmem %s1962_s1, %s1172_s30 }
  0x66   : > { %s1357_s18 = sld [smem:[#allocation3 + %s465_s14]]  ;;  %v277_v16 = vld [vmem:[%s2067_s16] sm:$0x1]  ;;  %s2071_s16 = scalar_lea.vmem %s1962_s1, %s1134_s8 }
  0x67   : > { %2059 = sst [smem:[#allocation45_spill]] %s1346_s13  ;;  %s534_s13 = sadd.s32 45, %s1124_s19  ;;  %v213_v18 = vld [vmem:[%s2071_s16] sm:$0x1]  ;;  %v303_v23 = vrot.slane %v277_v16, 7 }
  0x68   : > { %s1360_s10 = sld [smem:[#allocation3 + %s469_s3]]  ;;  %s514_s3 = sadd.s32 5, %s1124_s19  ;;  %v238_v29 = vrot.slane %v213_v18, 6 }
  0x69   : > { %s1372_s14 = sld [smem:[#allocation3 + %s473_s29]]  ;;  %s2081_s16 = scalar_lea.vmem %s1962_s1, %s1151_s26 }
  0x6a   : > { %s1374_s12 = sld [smem:[#allocation3 + %s477_s2]]  ;;  %s522_s2 = sadd.s32 21, %s1124_s19  ;;  %v1466_v24 = vld [vmem:[%s2081_s16] sm:$0x1]  ;;  %v258_v44 = vsel %vm257_vm5, %v256_v31, %v238_v29 }
  0x6b   : > { %s1377_s17 = sld [smem:[#allocation3 + %s481_s6]]  ;;  %s538_s16 = sadd.s32 53, %s1124_s19  ;;  %v247_v42 = vrot.slane %v1466_v24, 3 }
  0x6c   : > { %2060 = sst [smem:[#allocation46_spill]] %s1357_s18 }
  0x6d   : > { %s1388_s4 = sld [smem:[#allocation3 + %s514_s3]] }
  0x6e   : > { %2061 = sst [smem:[#allocation47_spill]] %s1360_s10 }
  0x6f   : > { %s2064_s29 = sld [smem:[#allocation17_spill]] }
  0x70   : > { %2062 = sst [smem:[#allocation48_spill]] %s1374_s12 }
  0x71   : > { %2063 = sst [smem:[#allocation49_spill]] %s1377_s17 }
  0x72   : > { %s1391_s23 = sld [smem:[#allocation3 + %s518_s25]] }
  0x73   : > { %s2066_s3 = sld [smem:[#allocation18_spill]] }
  0x74   : > { %s1412_s15 = sld [smem:[#allocation3 + %s522_s2]] }
  0x75   : > { %s2069_s11 = sld [smem:[#allocation19_spill]]  ;;  %s2073_s7 = scalar_lea.vmem %s1962_s1, %s2064_s29 }
  0x76   : > { %s1420_s5 = sld [smem:[#allocation3 + %s526_s0]]  ;;  %v1433_v19 = vld [vmem:[%s2073_s7] sm:$0x1]  ;;  %s2077_s7 = scalar_lea.vmem %s1962_s1, %s1175_s20 }
  0x77   : > { %s2070_s24 = sld [smem:[#allocation21_spill]]  ;;  %v281_v22 = vld [vmem:[%s2077_s7] sm:$0x1]  ;;  %s575_s0 = sadd.s32 6, %s1124_s19  ;;  %v241_v35 = vrot.slane %v1433_v19, 5 }
  0x78   : > { %s2072_s2 = sld [smem:[#allocation28_spill]]  ;;  %v306_v34 = vrot.slane %v281_v22, 6  ;;  %s542_s7 = sadd.s32 61, %s1124_s19 }
  0x79   : > { %s2074_s21 = sld [smem:[#allocation20_spill]]  ;;  %s2076_s9 = scalar_lea.vmem %s1962_s1, %s2066_s3  ;;  %v260_v56 = vsel %vm259_vm6, %v258_v44, %v241_v35 }
  0x7a   : > { %s2075_s8 = sld [smem:[#allocation22_spill]]  ;;  %v1448_v21 = vld [vmem:[%s2076_s9] sm:$0x1]  ;;  %s579_s9 = sadd.s32 14, %s1124_s19 }
  0x7b   : > { %s2078_s18 = sld [smem:[#allocation23_spill]]  ;;  %s2082_s20 = scalar_lea.vmem %s1962_s1, %s2069_s11  ;;  %v244_v39 = vrot.slane %v1448_v21, 4 }
  0x7c   : > { %s2079_s30 = sld [smem:[#allocation24_spill]]  ;;  %v1473_v25 = vld [vmem:[%s2082_s20] sm:$0x1] }
  0x7d   : > { %s1459_s22 = sld [smem:[#allocation3 + %s530_s28]]  ;;  %s2083_s28 = scalar_lea.vmem %s1962_s1, %s2070_s24  ;;  %v250_v43 = vrot.slane %v1473_v25, 2  ;;  %v262_v3 = vsel %vm261_vm7, %v260_v56, %v244_v39 }
  0x7e   : > { %v273_v26 = vld [vmem:[%s2083_s28] sm:$0x1]  ;;  %s2084_s26 = scalar_lea.vmem %s1962_s1, %s2072_s2  ;;  %s2085_s25 = sld [smem:[#allocation29_spill]]  ;;  %v264_v19 = vsel %vm263_vm8, %v262_v3, %v247_v42 }
  0x7f   : > { %v338_v27 = vld [vmem:[%s2084_s26] sm:$0x1]  ;;  %s1485_s3 = sld [smem:[#allocation3 + %s534_s13]]  ;;  %s2087_s29 = scalar_lea.vmem %s1962_s1, %s2074_s21  ;;  %v323_v36 = vsel %vm255_vm4, %v273_v26, %v303_v23 }
  0x80   : > { %v1493_v28 = vld [vmem:[%s2087_s29] sm:$0x1]  ;;  %s2088_s27 = scalar_lea.vmem %s1962_s1, %s2075_s8  ;;  %s2089_s13 = sld [smem:[#allocation27_spill]]  ;;  %v364_v38 = vrot.slane %v338_v27, 7  ;;  %v324_v49 = vsel %vm257_vm5, %v323_v36, %v306_v34  ;;  %v266_v36 = vsel %vm265_vm9, %v264_v19, %v250_v43 }
  0x81   : > { %v285_v30 = vld [vmem:[%s2088_s27] sm:$0x1]  ;;  %s2090_s6 = sld [smem:[#allocation36_spill]]  ;;  %s2091_s11 = scalar_lea.vmem %s1962_s1, %s2078_s18  ;;  %v253_v47 = vrot.slane %v1493_v28, 1 }
  0x82   : > { %v1511_v32 = vld [vmem:[%s2091_s11] sm:$0x1]  ;;  %s2092_s8 = scalar_lea.vmem %s1962_s1, %s2079_s30  ;;  %s2093_s2 = sld [smem:[#allocation30_spill]]  ;;  %v309_v45 = vrot.slane %v285_v30, 5 }
  0x83   : > { %2080 = sst [smem:[#allocation17_spill]] %s1459_s22  ;;  %v1518_v33 = vld [vmem:[%s2092_s8] sm:$0x1]  ;;  %s583_s8 = sadd.s32 22, %s1124_s19  ;;  %v312_v51 = vrot.slane %v1511_v32, 4 }
  0x84   : > { %s2094_s21 = scalar_lea.vmem %s1962_s1, %s2085_s25  ;;  %s1532_s30 = sld [smem:[#allocation3 + %s538_s16]]  ;;  %v315_v52 = vrot.slane %v1518_v33, 3  ;;  %v325_v60 = vsel %vm259_vm6, %v324_v49, %v309_v45 }
  0x85   : > { %2086 = sst [smem:[#allocation18_spill]] %s1485_s3  ;;  %v342_v37 = vld [vmem:[%s2094_s21] sm:$0x1]  ;;  %v326_v7 = vsel %vm261_vm7, %v325_v60, %v312_v51 }
  0x86   : > { %s2096_s11 = sld [smem:[#allocation25_spill]]  ;;  %s2097_s20 = scalar_lea.vmem %s1962_s1, %s2089_s13  ;;  %v367_v50 = vrot.slane %v342_v37, 6  ;;  %v327_v20 = vsel %vm263_vm8, %v326_v7, %v315_v52  ;;  %v268_v52 = vsel %vm267_vm10, %v266_v36, %v253_v47 }
  0x87   : > { %v334_v40 = vld [vmem:[%s2097_s20] sm:$0x1]  ;;  %s2098_s18 = scalar_lea.vmem %s1962_s1, %s2090_s6  ;;  %s1550_s21 = sld [smem:[#allocation3 + %s575_s0]] }
  0x88   : > { %v399_v41 = vld [vmem:[%s2098_s18] sm:$0x1]  ;;  %s2099_s29 = sld [smem:[#allocation37_spill]]  ;;  %s2100_s10 = scalar_lea.vmem %s1962_s1, %s2093_s2  ;;  %v384_v53 = vsel %vm255_vm4, %v334_v40, %v364_v38 }
  0x89   : > { %v346_v46 = vld [vmem:[%s2100_s10] sm:$0x1]  ;;  %s1564_s24 = sld [smem:[#allocation3 + %s542_s7]]  ;;  %v425_v55 = vrot.slane %v399_v41, 7  ;;  %s640_s0 = sadd.s32 15, %s1124_s19  ;;  %v385_v1 = vsel %vm257_vm5, %v384_v53, %v367_v50 }
  0x8a   : > { %2095 = sst [smem:[#allocation19_spill]] %s1532_s30  ;;  %v370_v58 = vrot.slane %v346_v46, 5  ;;  %s587_s30 = sadd.s32 30, %s1124_s19 }
  0x8b   : > { %s2102_s18 = sld [smem:[#allocation31_spill]] }
  0x8c   : > { %s2103_s28 = scalar_lea.vmem %s1962_s1, %s2096_s11  ;;  %s2104_s2 = sld [smem:[#allocation35_spill]]  ;;  %v386_v12 = vsel %vm259_vm6, %v385_v1, %v370_v58 }
  0x8d   : > { %v1572_v48 = vld [vmem:[%s2103_s28] sm:$0x1]  ;;  %s1575_s13 = sld [smem:[#allocation3 + %s579_s9]]  ;;  %s636_s28 = sadd.s32 7, %s1124_s19 }
  0x8e   : > { %s2105_s7 = sld [smem:[#allocation38_spill]]  ;;  %s2107_s6 = scalar_lea.vmem %s1962_s1, %s2099_s29  ;;  %v318_v0 = vrot.slane %v1572_v48, 2 }
  0x8f   : > { %2101 = sst [smem:[#allocation21_spill]] %s1564_s24  ;;  %v403_v54 = vld [vmem:[%s2107_s6] sm:$0x1]  ;;  %s591_s11 = sadd.s32 38, %s1124_s19 }
  0x90   : > { %s2106_s10 = sld [smem:[#allocation44_spill]]  ;;  %v428_v2 = vrot.slane %v403_v54, 6  ;;  %v328_v37 = vsel %vm265_vm9, %v327_v20, %v318_v0 }
  0x91   : > { %s2108_s20 = sld [smem:[#allocation26_spill]]  ;;  %s2109_s24 = scalar_lea.vmem %s1962_s1, %s2102_s18 }
  0x92   : > { %v350_v57 = vld [vmem:[%s2109_s24] sm:$0x1]  ;;  %s2110_s29 = scalar_lea.vmem %s1962_s1, %s2104_s2  ;;  %s2111_s9 = sld [smem:[#allocation32_spill]] }
  0x93   : > { %v395_v59 = vld [vmem:[%s2110_s29] sm:$0x1]  ;;  %s2112_s26 = sld [smem:[#allocation39_spill]]  ;;  %v373_v8 = vrot.slane %v350_v57, 4  ;;  %s595_s24 = sadd.s32 46, %s1124_s19 }
  0x94   : > { %s2113_s16 = scalar_lea.vmem %s1962_s1, %s2105_s7  ;;  %s1618_s2 = sld [smem:[#allocation3 + %s583_s8]]  ;;  %v445_v6 = vsel %vm255_vm4, %v395_v59, %v425_v55 }
  0x95   : > { %v407_v61 = vld [vmem:[%s2113_s16] sm:$0x1]  ;;  %s2116_s25 = sld [smem:[#allocation45_spill]]  ;;  %s644_s8 = sadd.s32 23, %s1124_s19  ;;  %v446_v18 = vsel %vm257_vm5, %v445_v6, %v428_v2  ;;  %v387_v26 = vsel %vm261_vm7, %v386_v12, %v373_v8 }
  0x96   : > { %s2114_s17 = scalar_lea.vmem %s1962_s1, %s2106_s10  ;;  %s1630_s12 = sld [smem:[#allocation3 + %s640_s0]]  ;;  %v431_v9 = vrot.slane %v407_v61, 5 }
  0x97   : > { %v460_v62 = vld [vmem:[%s2114_s17] sm:$0x1]  ;;  %s2115_s6 = scalar_lea.vmem %s1962_s1, %s2108_s20  ;;  %s2117_s7 = sld [smem:[#allocation43_spill]] }
  0x98   : > { %v1626_v63 = vld [vmem:[%s2115_s6] sm:$0x1]  ;;  %s2118_s20 = scalar_lea.vmem %s1962_s1, %s2111_s9  ;;  %s2120_s0 = sld [smem:[#allocation33_spill]]  ;;  %v486_v11 = vrot.slane %v460_v62, 7  ;;  %v447_v33 = vsel %vm259_vm6, %v446_v18, %v431_v9 }
  0x99   : > { %v354_v4 = vld [vmem:[%s2118_s20] sm:$0x1]  ;;  %s2119_s18 = scalar_lea.vmem %s1962_s1, %s2112_s26  ;;  %s1645_s17 = sld [smem:[#allocation3 + %s587_s30]]  ;;  %v321_v15 = vrot.slane %v1626_v63, 1 }
  0x9a   : > { %v411_v5 = vld [vmem:[%s2119_s18] sm:$0x1]  ;;  %s2122_s29 = sld [smem:[#allocation40_spill]]  ;;  %s577_s20 = scalar_lea.vmem %s1962_s1, %s1550_s21  ;;  %v376_v21 = vrot.slane %v354_v4, 3 }
  0x9b   : > { %s2123_s10 = scalar_lea.vmem %s1962_s1, %s2116_s25  ;;  %s2124_s30 = sld [smem:[#allocation46_spill]]  ;;  %v434_v24 = vrot.slane %v411_v5, 4  ;;  %v329_v53 = vsel %vm267_vm10, %v328_v37, %v321_v15  ;;  %v578_v55 = vld [vmem:[%s577_s20] sm:$0x1] }
  0x9c   : > { %v464_v10 = vld [vmem:[%s2123_s10] sm:$0x1]  ;;  %s1658_s16 = sld [smem:[#allocation3 + %s636_s28]]  ;;  %s2126_s25 = scalar_lea.vmem %s1962_s1, %s1391_s23  ;;  %v388_v25 = vsel %vm263_vm8, %v387_v26, %v376_v21  ;;  %v330_v8 = vadd.f32 %v329_v53, %v268_v52 }
  0x9d   : > { %s2125_s3 = scalar_lea.vmem %s1962_s1, %s2117_s7  ;;  %v521_v14 = vld [vmem:[%s2126_s25] sm:$0x1]  ;;  %s1671_s9 = sld [smem:[#allocation3 + %s644_s8]]  ;;  %v489_v23 = vrot.slane %v464_v10, 6  ;;  %v448_v46 = vsel %vm261_vm7, %v447_v33, %v434_v24 }
  0x9e   : > { %v456_v13 = vld [vmem:[%s2125_s3] sm:$0x1]  ;;  %s648_s6 = sadd.s32 31, %s1124_s19  ;;  %s2127_s26 = scalar_lea.vmem %s1962_s1, %s2120_s0  ;;  %v547_v30 = vrot.slane %v521_v14, 7 }
  0x9f   : > { %2121 = sst [smem:[#allocation28_spill]] %s1645_s17  ;;  %v358_v16 = vld [vmem:[%s2127_s26] sm:$0x1]  ;;  %s581_s8 = scalar_lea.vmem %s1962_s1, %s1575_s13  ;;  %v506_v27 = vsel %vm255_vm4, %v456_v13, %v486_v11 }
  0xa0   : > { %s2128_s3 = scalar_lea.vmem %s1962_s1, %s2122_s29  ;;  %s2129_s17 = sld [smem:[#allocation34_spill]]  ;;  %v379_v32 = vrot.slane %v358_v16, 2  ;;  %v582_v35 = vld [vmem:[%s581_s8] sm:$0x1]  ;;  %v507_v43 = vsel %vm257_vm5, %v506_v27, %v489_v23 }
  0xa1   : > { %v1685_v17 = vld [vmem:[%s2128_s3] sm:$0x1]  ;;  %s2130_s18 = scalar_lea.vmem %s1962_s1, %s2124_s30  ;;  %s1702_s25 = sld [smem:[#allocation3 + %s591_s11]]  ;;  %v608_v51 = vrot.slane %v582_v35, 7 }
  0xa2   : > { %v468_v22 = vld [vmem:[%s2130_s18] sm:$0x1]  ;;  %s599_s13 = sadd.s32 54, %s1124_s19  ;;  %s2131_s28 = sld [smem:[#allocation41_spill]]  ;;  %v437_v41 = vrot.slane %v1685_v17, 3  ;;  %v389_v57 = vsel %vm265_vm9, %v388_v25, %v379_v32 }
  0xa3   : > { %s2132_s10 = sld [smem:[#allocation47_spill]]  ;;  %s2133_s7 = scalar_lea.vmem %s1962_s1, %s1412_s15  ;;  %v492_v40 = vrot.slane %v468_v22, 5  ;;  %v628_v5 = vsel %vm255_vm4, %v578_v55, %v608_v51 }
  0xa4   : > { %v525_v29 = vld [vmem:[%s2133_s7] sm:$0x1]  ;;  %s1712_s30 = sld [smem:[#allocation3 + %s648_s6]]  ;;  %s652_s3 = sadd.s32 39, %s1124_s19  ;;  %v449_v62 = vsel %vm263_vm8, %v448_v46, %v437_v41 }
  0xa5   : > { %s2135_s15 = scalar_lea.vmem %s1962_s1, %s1388_s4  ;;  %s585_s26 = scalar_lea.vmem %s1962_s1, %s1618_s2  ;;  %v550_v45 = vrot.slane %v525_v29, 6  ;;  %v508_v59 = vsel %vm259_vm6, %v507_v43, %v492_v40 }
  0xa6   : > { %s2134_s22 = scalar_lea.vmem %s1962_s1, %s2129_s17  ;;  %v517_v34 = vld [vmem:[%s2135_s15] sm:$0x1]  ;;  %s1732_s27 = sld [smem:[#allocation3 + %s595_s24]] }
  0xa7   : > { %v1720_v31 = vld [vmem:[%s2134_s22] sm:$0x1]  ;;  %s2136_s17 = sld [smem:[#allocation17_spill]]  ;;  %s642_s15 = scalar_lea.vmem %s1962_s1, %s1630_s12  ;;  %v567_v49 = vsel %vm255_vm4, %v517_v34, %v547_v30 }
  0xa8   : > { %s2137_s4 = scalar_lea.vmem %s1962_s1, %s2131_s28  ;;  %s2139_s24 = sld [smem:[#allocation28_spill]]  ;;  %v586_v50 = vld [vmem:[%s585_s26] sm:$0x1]  ;;  %v382_v47 = vrot.slane %v1720_v31, 1  ;;  %v568_v0 = vsel %vm257_vm5, %v567_v49, %v550_v45 }
  0xa9   : > { %v1743_v38 = vld [vmem:[%s2137_s4] sm:$0x1]  ;;  %s2138_s2 = scalar_lea.vmem %s1962_s1, %s2132_s10  ;;  %s1750_s22 = sld [smem:[#allocation3 + %s599_s13]]  ;;  %v611_v2 = vrot.slane %v586_v50, 6 }
  0xaa   : > { %v472_v39 = vld [vmem:[%s2138_s2] sm:$0x1]  ;;  %s2140_s18 = scalar_lea.vmem %s1962_s1, %s1372_s14  ;;  %s2141_s7 = scalar_lea.vmem %s1962_s1, %s1420_s5  ;;  %v440_v61 = vrot.slane %v1743_v38, 2  ;;  %v390_v12 = vsel %vm267_vm10, %v389_v57, %v382_v47 }
  0xab   : > { %v1763_v42 = vld [vmem:[%s2140_s18] sm:$0x1]  ;;  %s1771_s12 = sld [smem:[#allocation3 + %s652_s3]]  ;;  %s656_s11 = sadd.s32 47, %s1124_s19  ;;  %v495_v54 = vrot.slane %v472_v39, 4  ;;  %v629_v20 = vsel %vm257_vm5, %v628_v5, %v611_v2  ;;  %v391_v29 = vadd.f32 %v390_v12, %v330_v8 }
  0xac   : > { %v529_v44 = vld [vmem:[%s2141_s7] sm:$0x1]  ;;  %s2143_s23 = sld [smem:[#allocation42_spill]]  ;;  %s603_s29 = sadd.s32 62, %s1124_s19  ;;  %v498_v3 = vrot.slane %v1763_v42, 3  ;;  %v450_v17 = vsel %vm265_vm9, %v449_v62, %v440_v61 }
  0xad   : > { %s2142_s8 = scalar_lea.vmem %s1962_s1, %s2136_s17  ;;  %s2144_s28 = sld [smem:[#allocation48_spill]]  ;;  %v643_v56 = vld [vmem:[%s642_s15] sm:$0x1]  ;;  %v553_v60 = vrot.slane %v529_v44, 5  ;;  %v509_v9 = vsel %vm261_vm7, %v508_v59, %v495_v54 }
  0xae   : > { %v1780_v48 = vld [vmem:[%s2142_s8] sm:$0x1]  ;;  %s589_s0 = scalar_lea.vmem %s1962_s1, %s2139_s24  ;;  %s2145_s24 = sld [smem:[#allocation19_spill]]  ;;  %v669_v7 = vrot.slane %v643_v56, 7  ;;  %v510_v23 = vsel %vm263_vm8, %v509_v9, %v498_v3 }
  0xaf   : > { %s638_s18 = scalar_lea.vmem %s1962_s1, %s1658_s16  ;;  %s646_s7 = scalar_lea.vmem %s1962_s1, %s1671_s9  ;;  %v590_v1 = vld [vmem:[%s589_s0] sm:$0x1]  ;;  %v556_v4 = vrot.slane %v1780_v48, 4  ;;  %v569_v14 = vsel %vm259_vm6, %v568_v0, %v553_v60 }
  0xb0   : > { %s2146_s8 = sld [smem:[#allocation51_spill]]  ;;  %s660_s9 = sadd.s32 55, %s1124_s19  ;;  %v647_v6 = vld [vmem:[%s646_s7] sm:$0x1]  ;;  %v614_v16 = vrot.slane %v590_v1, 5 }
  0xb1   : > { %s1816_s15 = sld [smem:[#allocation3 + %s656_s11]]  ;;  %s593_s4 = scalar_lea.vmem %s1962_s1, %s1702_s25  ;;  %v639_v11 = vld [vmem:[%s638_s18] sm:$0x1]  ;;  %v672_v22 = vrot.slane %v647_v6, 6  ;;  %v570_v30 = vsel %vm261_vm7, %v569_v14, %v556_v4 }
  0xb2   : > { %s2147_s5 = scalar_lea.vmem %s1962_s1, %s2143_s23  ;;  %s2149_s26 = sld [smem:[#allocation18_spill]]  ;;  %v594_v15 = vld [vmem:[%s593_s4] sm:$0x1]  ;;  %v689_v27 = vsel %vm255_vm4, %v639_v11, %v669_v7  ;;  %v630_v35 = vsel %vm259_vm6, %v629_v20, %v614_v16  ;;  %v716_v7 = vpop.permute.xlu0 %715 }
  0xb3   : > { %v423_v58 = vld [vmem:[%s2147_s5] sm:$0x1]  ;;  %s2148_s17 = scalar_lea.vmem %s1962_s1, %s2144_s28  ;;  %s1837_s28 = sld [smem:[#allocation3 + %s603_s29]]  ;;  %v617_v32 = vrot.slane %v594_v15, 4  ;;  %v690_v25 = vsel %vm257_vm5, %v689_v27, %v672_v22 }
  0xb4   : > { %v480_v63 = vld [vmem:[%s2148_s17] sm:$0x1]  ;;  %s540_s10 = scalar_lea.vmem %s1962_s1, %s2145_s24  ;;  %s2150_s21 = sld [smem:[#allocation49_spill]]  ;;  %v443_v13 = vrot.slane %v423_v58, 1 }
  0xb5   : > { %s650_s0 = scalar_lea.vmem %s1962_s1, %s1712_s30  ;;  %s1855_s7 = sld [smem:[#allocation3 + %s660_s9]]  ;;  %v501_v19 = vrot.slane %v480_v63, 2  ;;  %v541_v26 = vld [vmem:[%s540_s10] sm:$0x1]  ;;  %v631_v45 = vsel %vm261_vm7, %v630_v35, %v617_v32 }
  0xb6   : > { %v719_v28 = vld [vmem:[%s2146_s8] sm:$0xff]  ;;  %s664_s3 = sadd.s32 63, %s1124_s19  ;;  %s2152_s30 = sld [smem:[#allocation21_spill]]  ;;  %v451_v33 = vsel %vm267_vm10, %v450_v17, %v443_v13  ;;  %v562_v40 = vrot.slane %v541_v26, 2 }
  0xb7   : > { %746 = vmatpush.msra.mxu0 %v719_v28  ;;  %s597_s23 = scalar_lea.vmem %s1962_s1, %s1732_s27  ;;  %v651_v21 = vld [vmem:[%s650_s0] sm:$0x1]  ;;  %s654_s11 = scalar_lea.vmem %s1962_s1, %s1771_s12  ;;  %v511_v38 = vsel %vm265_vm9, %v510_v23, %v501_v19  ;;  %v452_v44 = vadd.f32 %v451_v33, %v391_v29 }
  0xb8   : > { %s2151_s5 = scalar_lea.vmem %s1962_s1, %s2149_s26  ;;  %v598_v31 = vld [vmem:[%s597_s23] sm:$0x1]  ;;  %s601_s25 = scalar_lea.vmem %s1962_s1, %s1750_s22  ;;  %v675_v37 = vrot.slane %v651_v21, 5 }
  0xb9   : > { %v537_v10 = vld [vmem:[%s2151_s5] sm:$0x1]  ;;  %s658_s20 = scalar_lea.vmem %s1962_s1, %s1816_s15  ;;  %s605_s29 = scalar_lea.vmem %s1962_s1, %s1837_s28  ;;  %v620_v43 = vrot.slane %v598_v31, 3 }
  0xba   : > { %s2153_s9 = scalar_lea.vmem %s1962_s1, %s2150_s21  ;;  %v559_v24 = vrot.slane %v537_v10, 3  ;;  %s1885_s21 = sld [smem:[#allocation3 + %s664_s3]]  ;;  %v655_v36 = vld [vmem:[%s654_s11] sm:$0x1]  ;;  %v691_v51 = vsel %vm259_vm6, %v690_v25, %v675_v37 }
  0xbb   : > { %v484_v18 = vld [vmem:[%s2153_s9] sm:$0x1]  ;;  %s662_s3 = scalar_lea.vmem %s1962_s1, %s1855_s7  ;;  %v678_v48 = vrot.slane %v655_v36, 4  ;;  %v632_v55 = vsel %vm263_vm8, %v631_v45, %v620_v43  ;;  %s2154_s7 = sld [smem:[#allocation9_spill]] }
  0xbc   : > { %s544_s8 = scalar_lea.vmem %s1962_s1, %s2152_s30  ;;  %v504_v34 = vrot.slane %v484_v18, 1  ;;  %v571_v41 = vsel %vm263_vm8, %v570_v30, %v559_v24  ;;  %v602_v42 = vld [vmem:[%s601_s25] sm:$0x1]  ;;  %s2155_s26 = sld [smem:[#allocation12_spill]] }
  0xbd   : > { %v545_v39 = vld [vmem:[%s544_s8] sm:$0x1]  ;;  %v572_v52 = vsel %vm265_vm9, %v571_v41, %v562_v40  ;;  %v623_v54 = vrot.slane %v602_v42, 2  ;;  %v692_v57 = vsel %vm261_vm7, %v691_v51, %v678_v48  ;;  %s2156_s6 = sld [smem:[#allocation53_spill]] }
  0xbe   : > { %v659_v46 = vld [vmem:[%s658_s20] sm:$0x1]  ;;  %v512_v49 = vsel %vm267_vm10, %v511_v38, %v504_v34  ;;  %v565_v50 = vrot.slane %v545_v39, 1  ;;  %s2158_s14 = sld [smem:[#allocation52_spill]] }
  0xbf   : > { %v606_v53 = vld [vmem:[%s605_s29] sm:$0x1]  ;;  %v681_v28 = vrot.slane %v659_v46, 3  ;;  %v513_v47 = vadd.f32 %v512_v49, %v452_v44  ;;  %v633_v60 = vsel %vm265_vm9, %v632_v55, %v623_v54 }
  0xc0   : > { %v663_v56 = vld [vmem:[%s662_s3] sm:$0x1]  ;;  %s666_s17 = scalar_lea.vmem %s1962_s1, %s1885_s21  ;;  %v573_v58 = vsel %vm267_vm10, %v572_v52, %v565_v50  ;;  %v626_v59 = vrot.slane %v606_v53, 1 }
  0xc1   : > { %v667_v61 = vld [vmem:[%s666_s17] sm:$0x1]  ;;  %v684_v62 = vrot.slane %v663_v56, 2  ;;  %v693_v63 = vsel %vm263_vm8, %v692_v57, %v681_v28  ;;  %v574_v0 = vadd.f32 %v573_v58, %v513_v47  ;;  %s195_s23 = sand.u32 1, %s2154_s7  }
  0xc2   : > { %v634_v1 = vsel %vm267_vm10, %v633_v60, %v626_v59  ;;  %v687_v2 = vrot.slane %v667_v61, 1  ;;  %s895_s16 = sshll.u32 %s195_s23, 3  ;;  %s900_s18 = sshll.u32 %s2155_s26, 3 }
  0xc3   : > { %v694_v3 = vsel %vm265_vm9, %v693_v63, %v684_v62  ;;  %v635_v4 = vadd.f32 %v634_v1, %v574_v0  ;;  %s763_s27 = scalar_lea.hbm %s2156_s6, %s900_s18  ;;  %s197_s8 = scalar_lea.vmem [#allocation4], %s895_s16 }
  0xc4   : > { %v695_v5 = vsel %vm267_vm10, %v694_v3, %v687_v2  ;;  %v945_v9 = vld [vmem:[%s2158_s14] ss:$0 sm:$0xff]  ;;  %s765_s21 = sshll.u32 %s197_s8, 4  ;;  %s767_s12 = sshll.u32 %s763_s27, 4  ;;  %s766_s21 = int_to_ptr.vmem [resolvable:$true] %s765_s21  ;;  %s768_s12 = int_to_ptr.hbm [resolvable:$true] %s767_s12 }
  0xc5   : > { %v696_v6 = vadd.f32 %v695_v5, %v635_v4  ;;  %s753_s0 = scalar_lea.sflag [#allocation5], %s195_s23  ;;  %s974_s25 = sshra.s32 %s768_s12, 4  ;;  %s975_s25 = int_to_ptr.hbm [resolvable:$true] %s974_s25 }
  0xc6   : > { %s976_s24 = scalar_lea.hbm %s975_s25, 8  ;;  %s980_s22 = scalar_lea.hbm %s2156_s6, 16 }
  0xc7   : > { %v718_v8 = vmul.f32 %v716_v7, %v696_v6  ;;  %p977_p11 = scmp.ne.s32.totalorder %s975_s25, %s976_s24  ;;  %p981_p0 = scmp.lt.s32.totalorder %s975_s25, %s2156_s6 }
  0xc8   : > { %p982_p1 = scmp.lt.s32.totalorder %s980_s22, %s976_s24 }
  0xc9   : > { %898 = vmatmul.msk.f32.vlgmr.msra.gmra.mxu0 %vm727_vm11, %v718_v8  ;;  %p978_p12 = pnand %p977_p11, %p1099_p5 }
  0xca   : > { %p983_p2 = por %p982_p1, %p981_p0 }
  0xcb   : > { %p979_p13 = pneg %p978_p12 }
  0xcd   : > { %p984_p3 = pnand %p983_p2, %p979_p13 }
 0x146   : > { %v748_v10 = vpop.f32.mrf.mxu0 }
 0x147   : > { %v749_v11 = vadd.f32 %v945_v9, %v748_v10 }
 0x149   : > { %751 = vst [vmem:[%s197_s8] sm:$0xff] %v749_v11 }
 0x14a   : > { %987 = shalt.err (!%p984_p3)
}
 0x14b   : > { %903 = dma.vmem_to_hbm [thread:$0]  (%p1099_p5), %s766_s21, 128, %s768_s12, %s753_s0  }
 0x14c PF: > { %s2159_s15 = sld [smem:[#allocation11_spill]] }
 0x14d   : > { %s2160_s2 = sld [smem:[#allocation8_spill]] }
 0x152   : > { %p909_p4 = scmp.ge.s32.totalorder %s2159_s15, 2 }
 0x153   : > { %s779_s28 = sand.u32 1, %s2160_s2  }
 0x154   : > { %p906_p7 = pnand %p909_p4, %p1103_p6  ;;  %s780_s30 = scalar_lea.sflag [#allocation5], %s779_s28 }
 0x156   : > { %p907_p8 = pneg %p906_p7 }
 0x158   : > { %1007 = dma.done.wait (%p907_p8), %s780_s30, 128  }
 0x159   : > { %1009 = vsyncadd (%p907_p8), %s780_s30, 4294967168  ;;  %s2162_s25 = sld [smem:[#allocation13_spill]] }
 0x15a   : > { %s2163_s22 = sld [smem:[#allocation9_spill]] }
 0x15b   : > { %s2164_s23 = sld [smem:[#allocation10_spill]] }
 0x15c   : > { %s2165_s24 = sld [smem:[#allocation14_spill]] }
 0x15f   : > { %p23_p9 = scmp.ge.s32.totalorder %s2162_s25, 4  }
 0x161   :  { %25 = sbr.rel (!%p23_p9) target bundleno = 12 (0xc), region = 135 }
 0x166   :  { %786 = vsyncpa [#allocation5], 1 }
 0x167   :  { %788 = vsyncpa [#allocation5 + $0x1], 1 }

</bundles_post_ra>
